<compile_context>
chip_gen: v7x
topology: tpu7x:2x2x1
jax: 0.10.0
libtpu: 0.0.40
codegen_flags: <defaults>
</compile_context>

<pallas_src>
import math
import numpy as np
import jax
import jax.numpy as jnp
from jax.experimental import pallas as pl
from jax.experimental.pallas import tpu as pltpu  # noqa: F401  (TPU backend)

# ------------------------- small config (consistent with module) -------------
B, S = 2, 8          # batch, sequence
H = 32               # hidden_size
NH = 4               # num_heads
HD = H // NH         # head dim (== rotary_dim, since rotary_dim=None)
FF = 128             # filter_size (4 * hidden)
V = 64               # vocab_size
VP = 128             # lane-padded vocab for a lane-dense final store
NLAYERS = 2          # num_hidden_layers
EPS = 1e-5           # layer_norm_epsilon
INIT_STD = 0.02      # initializer_range
NEG_INF = -1e9
T = B * S            # flattened token count
WPROJ = 4 * HD + H   # fused per-head projection width: q|qr|k|kr|(v@Wo) = 64


# ------------------------------- kernel ---------------------------------------
def _layer_norm(x, w, b):
    mu = jnp.mean(x, axis=-1, keepdims=True)
    xc = x - mu
    var = jnp.mean(xc * xc, axis=-1, keepdims=True)
    return xc * jax.lax.rsqrt(var + EPS) * w + b


def gptj_fused_kernel(x_ref, mask_ref, cs_ref, attn_ref, ffn_ref, vecs_ref,
                      final_ref, o_ref):
    """All GPT-J layers + final LN + lm_head, activations resident in VMEM.

    Per-layer weights are stacked on a leading NLAYERS axis; the (static,
    unrolled) Python loop indexes them with a constant layer index.
    """
    x = x_ref[...]                                   # (T, H)   f32 hidden
    mask = mask_ref[...]                             # (T, T)   additive mask
    # rotary tables, broadcast across heads ONCE (hoisted out of layer loop)
    cos = jnp.broadcast_to(cs_ref[0][None], (NH, T, HD))   # (NH, T, HD) f32
    sin = jnp.broadcast_to(cs_ref[1][None], (NH, T, HD))

    for l in range(NLAYERS):
        # per-layer small vectors (f32): ln_w | ln_b | b1 | b2 packed rows
        ln_w = vecs_ref[l, 0:1, 0:H]                 # (1, H)
        ln_b = vecs_ref[l, 1:2, 0:H]
        b1 = vecs_ref[l, 2:3, :]                     # (1, FF)
        b2 = vecs_ref[l, 3:4, 0:H]

        # shared LayerNorm (use_untied_layer_norm=False)
        h = _layer_norm(x, ln_w, ln_b)               # (T, H) f32
        hb = jnp.broadcast_to(h.astype(jnp.bfloat16)[None], (NH, T, H))

        # ONE fused head-batched projection (bf16 MXU, f32 accum):
        # lanes [0:8]=q*scale, [8:16]=q@rot*scale, [16:24]=k, [24:32]=k@rot,
        # [32:64]=h@(Wv@Wo). rotate_every_two + 1/sqrt(HD) folded at prep time.
        proj = jnp.einsum('hte,hed->htd', hb, attn_ref[l],
                          preferred_element_type=jnp.float32)  # (NH, T, 64)
        q = proj[..., 0:HD] * cos + proj[..., HD:2 * HD] * sin
        k = proj[..., 2 * HD:3 * HD] * cos + proj[..., 3 * HD:4 * HD] * sin
        vp = proj[..., 4 * HD:]                      # (NH, T, H) value@Wo

        # attention over all (batch, head) pairs at once; mask blocks
        # non-causal and cross-batch pairs. Softmax stats stay fp32.
        s = jnp.einsum('hqd,hkd->hqk', q.astype(jnp.bfloat16),
                       k.astype(jnp.bfloat16),
                       preferred_element_type=jnp.float32) + mask  # (NH,T,T)
        s = s - jnp.max(s, axis=-1, keepdims=True)
        p = jnp.exp(s)
        denom = jnp.sum(p, axis=-1, keepdims=True)                 # (NH,T,1)
        ctx = jnp.einsum('hqk,hkf->hqf', p.astype(jnp.bfloat16),
                         vp.astype(jnp.bfloat16),
                         preferred_element_type=jnp.float32)       # (NH,T,H)
        # exact reciprocal (not approx) per correctness note; then per-head
        # softmax-normalized, Wo-projected contexts sum directly to the
        # attention output (output projection already folded into vp).
        attn = jnp.sum(ctx * pl.reciprocal(denom, approx=False), axis=0)

        # FFN on the same normed activations (parallel GPT-J block).
        # TODO(synk): torch nn.GELU default is exact erf; tanh approximation
        # used here for robust Mosaic lowering.
        f = jnp.dot(h.astype(jnp.bfloat16), ffn_ref[l, 0:H, :],
                    preferred_element_type=jnp.float32) + b1
        f = jax.nn.gelu(f, approximate=True)
        f = jnp.dot(f.astype(jnp.bfloat16), ffn_ref[l, H:H + FF, 0:H],
                    preferred_element_type=jnp.float32) + b2

        # parallel residual (dropouts identity in eval)
        x = x + attn + f

    # final LayerNorm with gamma folded into lm_head rows and beta folded into
    # a precomputed bias row; lane-dense (T, VP) store.
    mu = jnp.mean(x, axis=-1, keepdims=True)
    xc = x - mu
    var = jnp.mean(xc * xc, axis=-1, keepdims=True)
    hf = xc * jax.lax.rsqrt(var + EPS)
    w = final_ref[0:H, :].astype(jnp.bfloat16)       # gamma-scaled lm_head^T
    bias = final_ref[H:H + 1, :]                     # beta @ lm_head^T (f32)
    o_ref[...] = jnp.dot(hf.astype(jnp.bfloat16), w,
                         preferred_element_type=jnp.float32) + bias


# ------------------------------ parameter setup -------------------------------
def trunc_normal(key, shape, std=INIT_STD):
    # truncated_normal(mean=0, std=std, a=-2*std, b=2*std)
    return jax.random.truncated_normal(key, -2.0, 2.0, shape, jnp.float32) * std


def init_params(key):
    keys = jax.random.split(key, 2 + NLAYERS)
    params = {
        "wte": trunc_normal(keys[0], (V, H)),                        # embedding
        "lm_w": jax.random.normal(keys[1], (V, H), jnp.float32) * INIT_STD,
        "lnf_w": jnp.ones((1, H), jnp.float32),
        "lnf_b": jnp.zeros((1, H), jnp.float32),
        "layers": [],
    }
    for l in range(NLAYERS):
        k = jax.random.split(keys[2 + l], 6)
        params["layers"].append({
            "ln_w": jnp.ones((1, H), jnp.float32),
            "ln_b": jnp.zeros((1, H), jnp.float32),
            "wq": trunc_normal(k[0], (H, H)),
            "wk": trunc_normal(k[1], (H, H)),
            "wv": trunc_normal(k[2], (H, H)),
            "wo": trunc_normal(k[3], (H, H)),
            "w1": trunc_normal(k[4], (H, FF)),
            "b1": jnp.zeros((1, FF), jnp.float32),
            "w2": trunc_normal(k[5], (FF, H)),
            "b2": jnp.zeros((1, H), jnp.float32),
        })
    return params


def _rotary_tables_np():
    pos = np.arange(S, dtype=np.float32)
    inv_freq = 1.0 / (10000.0 ** (np.arange(0, HD, 2, dtype=np.float32) / HD))
    sinusoid = pos[:, None] * inv_freq[None, :]             # (S, HD//2)
    sin = np.repeat(np.sin(sinusoid), 2, axis=-1)           # duplicate_interleave
    cos = np.repeat(np.cos(sinusoid), 2, axis=-1)           # (S, HD)
    sin_t = np.tile(sin, (B, 1)).astype(np.float32)         # (T, HD), batch-tiled
    cos_t = np.tile(cos, (B, 1)).astype(np.float32)
    # rotate_every_two as a (HD, HD) linear map on head features:
    #   (x @ P)[2i] = -x[2i+1],  (x @ P)[2i+1] = x[2i]
    P = np.zeros((HD, HD), np.float32)
    for i in range(HD // 2):
        P[2 * i + 1, 2 * i] = -1.0
        P[2 * i, 2 * i + 1] = 1.0
    return cos_t, sin_t, P


def _attention_mask_np():
    # causal within each batch element, -inf across batch elements
    batch = np.arange(T) // S
    posn = np.arange(T) % S
    ok = (batch[:, None] == batch[None, :]) & (posn[None, :] <= posn[:, None])
    return np.where(ok, 0.0, NEG_INF).astype(np.float32)


def prepare_params(params):
    """One-time packing: fused per-head projection slab (rotary, score scale,
    and output projection folded in), packed FFN / vector-param / final-head
    slabs, bf16 matmul weights."""
    cos_t, sin_t, rot_P = _rotary_tables_np()
    scale = 1.0 / math.sqrt(HD)
    rot = jnp.asarray(rot_P)                                # (HD, HD)

    attn_slabs, ffn_slabs, vec_slabs = [], [], []
    for lyr in params["layers"]:
        # head-split projection weights: (H, H) -> (NH, H, HD)
        wq_h = jnp.transpose(lyr["wq"].reshape(H, NH, HD), (1, 0, 2)) * scale
        wk_h = jnp.transpose(lyr["wk"].reshape(H, NH, HD), (1, 0, 2))
        wv_h = jnp.transpose(lyr["wv"].reshape(H, NH, HD), (1, 0, 2))
        wo_h = lyr["wo"].reshape(NH, HD, H)                 # per-head out-proj
        wq_r = jnp.einsum('hed,df->hef', wq_h, rot)         # fold rotate_every_two
        wk_r = jnp.einsum('hed,df->hef', wk_h, rot)
        wvo = jnp.einsum('hed,hdf->hef', wv_h, wo_h)        # fold Wo into Wv
        attn_slabs.append(
            jnp.concatenate([wq_h, wq_r, wk_h, wk_r, wvo], axis=-1))  # (NH,H,64)

        w1 = lyr["w1"]                                      # (H, FF)
        w2 = jnp.pad(lyr["w2"], ((0, 0), (0, FF - H)))      # (FF, 128) lane-pad
        ffn_slabs.append(jnp.concatenate([w1, w2], axis=0))  # (H+FF, 128)

        def _pad_row(v):
            v = v.reshape(1, -1)
            return jnp.pad(v, ((0, 0), (0, 128 - v.shape[1])))
        vec_slabs.append(jnp.concatenate(
            [_pad_row(lyr["ln_w"]), _pad_row(lyr["ln_b"]),
             lyr["b1"].reshape(1, FF), _pad_row(lyr["b2"])], axis=0))  # (4,128)

    attn_w = jnp.stack(attn_slabs).astype(jnp.bfloat16)     # (L, NH, H, 64)
    ffn_w = jnp.stack(ffn_slabs).astype(jnp.bfloat16)       # (L, H+FF, 128)
    vecs = jnp.stack(vec_slabs).astype(jnp.float32)         # (L, 4, 128)

    # final LN gamma folded into lm_head rows; beta folded into a bias row
    lm_t = params["lm_w"].T                                  # (H, V)
    w_scaled = lm_t * params["lnf_w"].reshape(H, 1)
    w_pad = jnp.pad(w_scaled, ((0, 0), (0, VP - V)))         # (H, VP)
    bias = params["lnf_b"].reshape(1, H) @ w_pad             # (1, VP)
    final_w = jnp.concatenate([w_pad, bias], axis=0).astype(jnp.float32)

    cos_sin = jnp.stack([jnp.asarray(cos_t), jnp.asarray(sin_t)])  # (2, T, HD)

    return {
        "wte": params["wte"],
        "mask": jnp.asarray(_attention_mask_np()),
        "cos_sin": cos_sin,
        "attn_w": attn_w,
        "ffn_w": ffn_w,
        "vecs": vecs,
        "final_w": final_w,
    }


# ---------------------------------- wrapper ------------------------------------
@jax.jit
def gptj_forward(input_ids, prep):
    # glue: embedding gather stays in plain JAX (not the hot path)
    hidden = jnp.take(prep["wte"], input_ids.reshape(-1), axis=0)   # (T, H)
    logits_pad = pl.pallas_call(
        gptj_fused_kernel,
        out_shape=jax.ShapeDtypeStruct((T, VP), jnp.float32),
    )(hidden, prep["mask"], prep["cos_sin"], prep["attn_w"],
      prep["ffn_w"], prep["vecs"], prep["final_w"])
    return logits_pad[:, :V].reshape(B, S, V)


# ------------------------------------ main --------------------------------------
if __name__ == "__main__":
    key = jax.random.PRNGKey(0)
    k_ids, k_params = jax.random.split(key)
    input_ids = jax.random.randint(k_ids, (B, S), 0, V, dtype=jnp.int32)
    params = init_params(k_params)
    prep = prepare_params(params)

    logits = gptj_forward(input_ids, prep)
    logits = jax.block_until_ready(logits)
    assert logits.shape == (B, S, V) and logits.dtype == jnp.float32
    assert bool(jnp.all(jnp.isfinite(logits)))
    print("KERNEL_OK")
</pallas_src>

<mosaic_0001>
module attributes {stable_mosaic.version = 11 : i64} {
  func.func @gptj_fused_kernel(%arg0: memref<16x32xf32, #tpu.memory_space<vmem>>, %arg1: memref<16x16xf32, #tpu.memory_space<vmem>>, %arg2: memref<2x16x8xf32, #tpu.memory_space<vmem>>, %arg3: memref<2x4x32x64xbf16, #tpu.memory_space<vmem>>, %arg4: memref<2x160x128xbf16, #tpu.memory_space<vmem>>, %arg5: memref<2x4x128xf32, #tpu.memory_space<vmem>>, %arg6: memref<33x128xf32, #tpu.memory_space<vmem>>, %arg7: memref<16x128xf32, #tpu.memory_space<vmem>>) attributes {dimension_semantics = [], scalar_prefetch = 0 : i64, scratch_operands = 0 : i64, tpu.core_type = #tpu.core_type<tc>} {
    %c0 = arith.constant 0 : index
    %c0_0 = arith.constant 0 : index
    %0 = vector.load %arg0[%c0, %c0_0] : memref<16x32xf32, #tpu.memory_space<vmem>>, vector<16x32xf32>
    %c0_1 = arith.constant 0 : index
    %c0_2 = arith.constant 0 : index
    %1 = vector.load %arg1[%c0_1, %c0_2] : memref<16x16xf32, #tpu.memory_space<vmem>>, vector<16x16xf32>
    %c0_3 = arith.constant 0 : index
    %c0_4 = arith.constant 0 : index
    %c0_5 = arith.constant 0 : index
    %2 = vector.load %arg2[%c0_3, %c0_4, %c0_5] : memref<2x16x8xf32, #tpu.memory_space<vmem>>, vector<1x16x8xf32>
    %3 = vector.shape_cast %2 : vector<1x16x8xf32> to vector<16x8xf32>
    %4 = vector.shape_cast %3 : vector<16x8xf32> to vector<1x16x8xf32>
    %5 = vector.shape_cast %4 : vector<1x16x8xf32> to vector<1x16x8xf32>
    %6 = vector.broadcast %5 : vector<1x16x8xf32> to vector<4x16x8xf32>
    %c1 = arith.constant 1 : index
    %c0_6 = arith.constant 0 : index
    %c0_7 = arith.constant 0 : index
    %7 = vector.load %arg2[%c1, %c0_6, %c0_7] : memref<2x16x8xf32, #tpu.memory_space<vmem>>, vector<1x16x8xf32>
    %8 = vector.shape_cast %7 : vector<1x16x8xf32> to vector<16x8xf32>
    %9 = vector.shape_cast %8 : vector<16x8xf32> to vector<1x16x8xf32>
    %10 = vector.shape_cast %9 : vector<1x16x8xf32> to vector<1x16x8xf32>
    %11 = vector.broadcast %10 : vector<1x16x8xf32> to vector<4x16x8xf32>
    %c0_8 = arith.constant 0 : index
    %c0_9 = arith.constant 0 : index
    %c0_10 = arith.constant 0 : index
    %12 = vector.load %arg5[%c0_8, %c0_9, %c0_10] : memref<2x4x128xf32, #tpu.memory_space<vmem>>, vector<1x1x32xf32>
    %13 = vector.shape_cast %12 : vector<1x1x32xf32> to vector<1x32xf32>
    %c0_11 = arith.constant 0 : index
    %c1_12 = arith.constant 1 : index
    %c0_13 = arith.constant 0 : index
    %14 = vector.load %arg5[%c0_11, %c1_12, %c0_13] : memref<2x4x128xf32, #tpu.memory_space<vmem>>, vector<1x1x32xf32>
    %15 = vector.shape_cast %14 : vector<1x1x32xf32> to vector<1x32xf32>
    %c0_14 = arith.constant 0 : index
    %c2 = arith.constant 2 : index
    %c0_15 = arith.constant 0 : index
    %16 = vector.load %arg5[%c0_14, %c2, %c0_15] : memref<2x4x128xf32, #tpu.memory_space<vmem>>, vector<1x1x128xf32>
    %17 = vector.shape_cast %16 : vector<1x1x128xf32> to vector<1x128xf32>
    %c0_16 = arith.constant 0 : index
    %c3 = arith.constant 3 : index
    %c0_17 = arith.constant 0 : index
    %18 = vector.load %arg5[%c0_16, %c3, %c0_17] : memref<2x4x128xf32, #tpu.memory_space<vmem>>, vector<1x1x32xf32>
    %19 = vector.shape_cast %18 : vector<1x1x32xf32> to vector<1x32xf32>
    %cst = arith.constant dense<0.000000e+00> : vector<16xf32>
    %20 = vector.multi_reduction <add>, %0, %cst [1] : vector<16x32xf32> to vector<16xf32>
    %21 = vector.shape_cast %20 : vector<16xf32> to vector<16x1xf32>
    %cst_18 = arith.constant 3.200000e+01 : f32
    %22 = vector.broadcast %cst_18 : f32 to vector<16x1xf32>
    %23 = arith.divf %21, %22 : vector<16x1xf32>
    %24 = vector.broadcast %23 : vector<16x1xf32> to vector<16x32xf32>
    %25 = arith.subf %0, %24 : vector<16x32xf32>
    %26 = arith.mulf %25, %25 : vector<16x32xf32>
    %cst_19 = arith.constant dense<0.000000e+00> : vector<16xf32>
    %27 = vector.multi_reduction <add>, %26, %cst_19 [1] : vector<16x32xf32> to vector<16xf32>
    %28 = vector.shape_cast %27 : vector<16xf32> to vector<16x1xf32>
    %cst_20 = arith.constant 3.200000e+01 : f32
    %29 = vector.broadcast %cst_20 : f32 to vector<16x1xf32>
    %30 = arith.divf %28, %29 : vector<16x1xf32>
    %cst_21 = arith.constant 9.99999974E-6 : f32
    %31 = vector.broadcast %cst_21 : f32 to vector<16x1xf32>
    %32 = arith.addf %30, %31 : vector<16x1xf32>
    %33 = math.rsqrt %32 : vector<16x1xf32>
    %34 = vector.broadcast %33 : vector<16x1xf32> to vector<16x32xf32>
    %35 = arith.mulf %25, %34 : vector<16x32xf32>
    %36 = vector.broadcast %13 : vector<1x32xf32> to vector<16x32xf32>
    %37 = arith.mulf %35, %36 : vector<16x32xf32>
    %38 = vector.broadcast %15 : vector<1x32xf32> to vector<16x32xf32>
    %39 = arith.addf %37, %38 : vector<16x32xf32>
    %40 = arith.truncf %39 : vector<16x32xf32> to vector<16x32xbf16>
    %41 = vector.shape_cast %40 : vector<16x32xbf16> to vector<1x16x32xbf16>
    %42 = vector.shape_cast %41 : vector<1x16x32xbf16> to vector<1x16x32xbf16>
    %43 = vector.broadcast %42 : vector<1x16x32xbf16> to vector<4x16x32xbf16>
    %c0_22 = arith.constant 0 : index
    %c0_23 = arith.constant 0 : index
    %c0_24 = arith.constant 0 : index
    %c0_25 = arith.constant 0 : index
    %44 = vector.load %arg3[%c0_22, %c0_23, %c0_24, %c0_25] : memref<2x4x32x64xbf16, #tpu.memory_space<vmem>>, vector<1x4x32x64xbf16>
    %45 = vector.shape_cast %44 : vector<1x4x32x64xbf16> to vector<4x32x64xbf16>
    "tpu.trace_start"() <{level = 10 : i32, message = "hte,hed->htd"}> : () -> ()
    %cst_26 = arith.constant dense<0.000000e+00> : vector<4x16x64xf32>
    %46 = tpu.matmul %43, %45, %cst_26 {dimension_numbers = #tpu.dot_dimension_numbers<[2], [1], [1], [2], [0, 0, 0, 1, 1, 2], [0], [0]>} : vector<4x16x32xbf16>, vector<4x32x64xbf16>, vector<4x16x64xf32> -> vector<4x16x64xf32>
    "tpu.trace_stop"() : () -> ()
    %47 = vector.extract_strided_slice %46 {offsets = [0, 0, 0], sizes = [4, 16, 8], strides = [1, 1, 1]} : vector<4x16x64xf32> to vector<4x16x8xf32>
    %48 = arith.mulf %47, %6 : vector<4x16x8xf32>
    %49 = vector.extract_strided_slice %46 {offsets = [0, 0, 8], sizes = [4, 16, 8], strides = [1, 1, 1]} : vector<4x16x64xf32> to vector<4x16x8xf32>
    %50 = arith.mulf %49, %11 : vector<4x16x8xf32>
    %51 = arith.addf %48, %50 : vector<4x16x8xf32>
    %52 = vector.extract_strided_slice %46 {offsets = [0, 0, 16], sizes = [4, 16, 8], strides = [1, 1, 1]} : vector<4x16x64xf32> to vector<4x16x8xf32>
    %53 = arith.mulf %52, %6 : vector<4x16x8xf32>
    %54 = vector.extract_strided_slice %46 {offsets = [0, 0, 24], sizes = [4, 16, 8], strides = [1, 1, 1]} : vector<4x16x64xf32> to vector<4x16x8xf32>
    %55 = arith.mulf %54, %11 : vector<4x16x8xf32>
    %56 = arith.addf %53, %55 : vector<4x16x8xf32>
    %57 = vector.extract_strided_slice %46 {offsets = [0, 0, 32], sizes = [4, 16, 32], strides = [1, 1, 1]} : vector<4x16x64xf32> to vector<4x16x32xf32>
    %58 = arith.truncf %51 : vector<4x16x8xf32> to vector<4x16x8xbf16>
    %59 = arith.truncf %56 : vector<4x16x8xf32> to vector<4x16x8xbf16>
    "tpu.trace_start"() <{level = 10 : i32, message = "hqd,hkd->hqk"}> : () -> ()
    %cst_27 = arith.constant dense<0.000000e+00> : vector<4x16x16xf32>
    %60 = tpu.matmul %58, %59, %cst_27 {dimension_numbers = #tpu.dot_dimension_numbers<[2], [2], [1], [1], [0, 0, 0, 1, 1, 1], [0], [0]>} : vector<4x16x8xbf16>, vector<4x16x8xbf16>, vector<4x16x16xf32> -> vector<4x16x16xf32>
    "tpu.trace_stop"() : () -> ()
    %61 = vector.shape_cast %1 : vector<16x16xf32> to vector<1x16x16xf32>
    %62 = vector.broadcast %61 : vector<1x16x16xf32> to vector<4x16x16xf32>
    %63 = arith.addf %60, %62 : vector<4x16x16xf32>
    %cst_28 = arith.constant dense<0xFF800000> : vector<4x16xf32>
    %64 = vector.multi_reduction <maximumf>, %63, %cst_28 [2] : vector<4x16x16xf32> to vector<4x16xf32>
    %65 = vector.shape_cast %64 : vector<4x16xf32> to vector<4x16x1xf32>
    %66 = vector.broadcast %65 : vector<4x16x1xf32> to vector<4x16x16xf32>
    %67 = arith.subf %63, %66 : vector<4x16x16xf32>
    %68 = math.exp %67 : vector<4x16x16xf32>
    %cst_29 = arith.constant dense<0.000000e+00> : vector<4x16xf32>
    %69 = vector.multi_reduction <add>, %68, %cst_29 [2] : vector<4x16x16xf32> to vector<4x16xf32>
    %70 = vector.shape_cast %69 : vector<4x16xf32> to vector<4x16x1xf32>
    %71 = arith.truncf %68 : vector<4x16x16xf32> to vector<4x16x16xbf16>
    %72 = arith.truncf %57 : vector<4x16x32xf32> to vector<4x16x32xbf16>
    "tpu.trace_start"() <{level = 10 : i32, message = "hqk,hkf->hqf"}> : () -> ()
    %cst_30 = arith.constant dense<0.000000e+00> : vector<4x16x32xf32>
    %73 = tpu.matmul %71, %72, %cst_30 {dimension_numbers = #tpu.dot_dimension_numbers<[2], [1], [1], [2], [0, 0, 0, 1, 1, 2], [0], [0]>} : vector<4x16x16xbf16>, vector<4x16x32xbf16>, vector<4x16x32xf32> -> vector<4x16x32xf32>
    "tpu.trace_stop"() : () -> ()
    %74 = tpu.reciprocal %70 : vector<4x16x1xf32> -> vector<4x16x1xf32>
    %75 = vector.broadcast %74 : vector<4x16x1xf32> to vector<4x16x32xf32>
    %76 = arith.mulf %73, %75 : vector<4x16x32xf32>
    %cst_31 = arith.constant dense<0.000000e+00> : vector<16x32xf32>
    %77 = vector.multi_reduction <add>, %76, %cst_31 [0] : vector<4x16x32xf32> to vector<16x32xf32>
    %78 = arith.truncf %39 : vector<16x32xf32> to vector<16x32xbf16>
    %c0_32 = arith.constant 0 : index
    %c0_33 = arith.constant 0 : index
    %c0_34 = arith.constant 0 : index
    %79 = vector.load %arg4[%c0_32, %c0_33, %c0_34] : memref<2x160x128xbf16, #tpu.memory_space<vmem>>, vector<1x32x128xbf16>
    %80 = vector.shape_cast %79 : vector<1x32x128xbf16> to vector<32x128xbf16>
    %cst_35 = arith.constant dense<0.000000e+00> : vector<16x128xf32>
    %81 = tpu.matmul %78, %80, %cst_35 {dimension_numbers = #tpu.dot_dimension_numbers<[1], [0], [0], [1], [0, 0, 1, 1], [], []>} : vector<16x32xbf16>, vector<32x128xbf16>, vector<16x128xf32> -> vector<16x128xf32>
    %82 = vector.broadcast %17 : vector<1x128xf32> to vector<16x128xf32>
    %83 = arith.addf %81, %82 : vector<16x128xf32>
    %84 = arith.mulf %83, %83 : vector<16x128xf32>
    %85 = arith.mulf %83, %84 : vector<16x128xf32>
    %cst_36 = arith.constant 4.471500e-02 : f32
    %86 = vector.broadcast %cst_36 : f32 to vector<16x128xf32>
    %87 = arith.mulf %86, %85 : vector<16x128xf32>
    %88 = arith.addf %83, %87 : vector<16x128xf32>
    %cst_37 = arith.constant 0.797884583 : f32
    %89 = vector.broadcast %cst_37 : f32 to vector<16x128xf32>
    %90 = arith.mulf %89, %88 : vector<16x128xf32>
    %91 = math.tanh %90 : vector<16x128xf32>
    %cst_38 = arith.constant 1.000000e+00 : f32
    %92 = vector.broadcast %cst_38 : f32 to vector<16x128xf32>
    %93 = arith.addf %92, %91 : vector<16x128xf32>
    %cst_39 = arith.constant 5.000000e-01 : f32
    %94 = vector.broadcast %cst_39 : f32 to vector<16x128xf32>
    %95 = arith.mulf %94, %93 : vector<16x128xf32>
    %96 = arith.mulf %83, %95 : vector<16x128xf32>
    %97 = arith.truncf %96 : vector<16x128xf32> to vector<16x128xbf16>
    %c0_40 = arith.constant 0 : index
    %c32 = arith.constant 32 : index
    %c0_41 = arith.constant 0 : index
    %98 = vector.load %arg4[%c0_40, %c32, %c0_41] : memref<2x160x128xbf16, #tpu.memory_space<vmem>>, vector<1x128x32xbf16>
    %99 = vector.shape_cast %98 : vector<1x128x32xbf16> to vector<128x32xbf16>
    %cst_42 = arith.constant dense<0.000000e+00> : vector<16x32xf32>
    %100 = tpu.matmul %97, %99, %cst_42 {dimension_numbers = #tpu.dot_dimension_numbers<[1], [0], [0], [1], [0, 0, 1, 1], [], []>} : vector<16x128xbf16>, vector<128x32xbf16>, vector<16x32xf32> -> vector<16x32xf32>
    %101 = vector.broadcast %19 : vector<1x32xf32> to vector<16x32xf32>
    %102 = arith.addf %100, %101 : vector<16x32xf32>
    %103 = arith.addf %0, %77 : vector<16x32xf32>
    %104 = arith.addf %103, %102 : vector<16x32xf32>
    %c1_43 = arith.constant 1 : index
    %c0_44 = arith.constant 0 : index
    %c0_45 = arith.constant 0 : index
    %105 = vector.load %arg5[%c1_43, %c0_44, %c0_45] : memref<2x4x128xf32, #tpu.memory_space<vmem>>, vector<1x1x32xf32>
    %106 = vector.shape_cast %105 : vector<1x1x32xf32> to vector<1x32xf32>
    %c1_46 = arith.constant 1 : index
    %c1_47 = arith.constant 1 : index
    %c0_48 = arith.constant 0 : index
    %107 = vector.load %arg5[%c1_46, %c1_47, %c0_48] : memref<2x4x128xf32, #tpu.memory_space<vmem>>, vector<1x1x32xf32>
    %108 = vector.shape_cast %107 : vector<1x1x32xf32> to vector<1x32xf32>
    %c1_49 = arith.constant 1 : index
    %c2_50 = arith.constant 2 : index
    %c0_51 = arith.constant 0 : index
    %109 = vector.load %arg5[%c1_49, %c2_50, %c0_51] : memref<2x4x128xf32, #tpu.memory_space<vmem>>, vector<1x1x128xf32>
    %110 = vector.shape_cast %109 : vector<1x1x128xf32> to vector<1x128xf32>
    %c1_52 = arith.constant 1 : index
    %c3_53 = arith.constant 3 : index
    %c0_54 = arith.constant 0 : index
    %111 = vector.load %arg5[%c1_52, %c3_53, %c0_54] : memref<2x4x128xf32, #tpu.memory_space<vmem>>, vector<1x1x32xf32>
    %112 = vector.shape_cast %111 : vector<1x1x32xf32> to vector<1x32xf32>
    %cst_55 = arith.constant dense<0.000000e+00> : vector<16xf32>
    %113 = vector.multi_reduction <add>, %104, %cst_55 [1] : vector<16x32xf32> to vector<16xf32>
    %114 = vector.shape_cast %113 : vector<16xf32> to vector<16x1xf32>
    %cst_56 = arith.constant 3.200000e+01 : f32
    %115 = vector.broadcast %cst_56 : f32 to vector<16x1xf32>
    %116 = arith.divf %114, %115 : vector<16x1xf32>
    %117 = vector.broadcast %116 : vector<16x1xf32> to vector<16x32xf32>
    %118 = arith.subf %104, %117 : vector<16x32xf32>
    %119 = arith.mulf %118, %118 : vector<16x32xf32>
    %cst_57 = arith.constant dense<0.000000e+00> : vector<16xf32>
    %120 = vector.multi_reduction <add>, %119, %cst_57 [1] : vector<16x32xf32> to vector<16xf32>
    %121 = vector.shape_cast %120 : vector<16xf32> to vector<16x1xf32>
    %cst_58 = arith.constant 3.200000e+01 : f32
    %122 = vector.broadcast %cst_58 : f32 to vector<16x1xf32>
    %123 = arith.divf %121, %122 : vector<16x1xf32>
    %cst_59 = arith.constant 9.99999974E-6 : f32
    %124 = vector.broadcast %cst_59 : f32 to vector<16x1xf32>
    %125 = arith.addf %123, %124 : vector<16x1xf32>
    %126 = math.rsqrt %125 : vector<16x1xf32>
    %127 = vector.broadcast %126 : vector<16x1xf32> to vector<16x32xf32>
    %128 = arith.mulf %118, %127 : vector<16x32xf32>
    %129 = vector.broadcast %106 : vector<1x32xf32> to vector<16x32xf32>
    %130 = arith.mulf %128, %129 : vector<16x32xf32>
    %131 = vector.broadcast %108 : vector<1x32xf32> to vector<16x32xf32>
    %132 = arith.addf %130, %131 : vector<16x32xf32>
    %133 = arith.truncf %132 : vector<16x32xf32> to vector<16x32xbf16>
    %134 = vector.shape_cast %133 : vector<16x32xbf16> to vector<1x16x32xbf16>
    %135 = vector.shape_cast %134 : vector<1x16x32xbf16> to vector<1x16x32xbf16>
    %136 = vector.broadcast %135 : vector<1x16x32xbf16> to vector<4x16x32xbf16>
    %c1_60 = arith.constant 1 : index
    %c0_61 = arith.constant 0 : index
    %c0_62 = arith.constant 0 : index
    %c0_63 = arith.constant 0 : index
    %137 = vector.load %arg3[%c1_60, %c0_61, %c0_62, %c0_63] : memref<2x4x32x64xbf16, #tpu.memory_space<vmem>>, vector<1x4x32x64xbf16>
    %138 = vector.shape_cast %137 : vector<1x4x32x64xbf16> to vector<4x32x64xbf16>
    "tpu.trace_start"() <{level = 10 : i32, message = "hte,hed->htd"}> : () -> ()
    %cst_64 = arith.constant dense<0.000000e+00> : vector<4x16x64xf32>
    %139 = tpu.matmul %136, %138, %cst_64 {dimension_numbers = #tpu.dot_dimension_numbers<[2], [1], [1], [2], [0, 0, 0, 1, 1, 2], [0], [0]>} : vector<4x16x32xbf16>, vector<4x32x64xbf16>, vector<4x16x64xf32> -> vector<4x16x64xf32>
    "tpu.trace_stop"() : () -> ()
    %140 = vector.extract_strided_slice %139 {offsets = [0, 0, 0], sizes = [4, 16, 8], strides = [1, 1, 1]} : vector<4x16x64xf32> to vector<4x16x8xf32>
    %141 = arith.mulf %140, %6 : vector<4x16x8xf32>
    %142 = vector.extract_strided_slice %139 {offsets = [0, 0, 8], sizes = [4, 16, 8], strides = [1, 1, 1]} : vector<4x16x64xf32> to vector<4x16x8xf32>
    %143 = arith.mulf %142, %11 : vector<4x16x8xf32>
    %144 = arith.addf %141, %143 : vector<4x16x8xf32>
    %145 = vector.extract_strided_slice %139 {offsets = [0, 0, 16], sizes = [4, 16, 8], strides = [1, 1, 1]} : vector<4x16x64xf32> to vector<4x16x8xf32>
    %146 = arith.mulf %145, %6 : vector<4x16x8xf32>
    %147 = vector.extract_strided_slice %139 {offsets = [0, 0, 24], sizes = [4, 16, 8], strides = [1, 1, 1]} : vector<4x16x64xf32> to vector<4x16x8xf32>
    %148 = arith.mulf %147, %11 : vector<4x16x8xf32>
    %149 = arith.addf %146, %148 : vector<4x16x8xf32>
    %150 = vector.extract_strided_slice %139 {offsets = [0, 0, 32], sizes = [4, 16, 32], strides = [1, 1, 1]} : vector<4x16x64xf32> to vector<4x16x32xf32>
    %151 = arith.truncf %144 : vector<4x16x8xf32> to vector<4x16x8xbf16>
    %152 = arith.truncf %149 : vector<4x16x8xf32> to vector<4x16x8xbf16>
    "tpu.trace_start"() <{level = 10 : i32, message = "hqd,hkd->hqk"}> : () -> ()
    %cst_65 = arith.constant dense<0.000000e+00> : vector<4x16x16xf32>
    %153 = tpu.matmul %151, %152, %cst_65 {dimension_numbers = #tpu.dot_dimension_numbers<[2], [2], [1], [1], [0, 0, 0, 1, 1, 1], [0], [0]>} : vector<4x16x8xbf16>, vector<4x16x8xbf16>, vector<4x16x16xf32> -> vector<4x16x16xf32>
    "tpu.trace_stop"() : () -> ()
    %154 = vector.shape_cast %1 : vector<16x16xf32> to vector<1x16x16xf32>
    %155 = vector.broadcast %154 : vector<1x16x16xf32> to vector<4x16x16xf32>
    %156 = arith.addf %153, %155 : vector<4x16x16xf32>
    %cst_66 = arith.constant dense<0xFF800000> : vector<4x16xf32>
    %157 = vector.multi_reduction <maximumf>, %156, %cst_66 [2] : vector<4x16x16xf32> to vector<4x16xf32>
    %158 = vector.shape_cast %157 : vector<4x16xf32> to vector<4x16x1xf32>
    %159 = vector.broadcast %158 : vector<4x16x1xf32> to vector<4x16x16xf32>
    %160 = arith.subf %156, %159 : vector<4x16x16xf32>
    %161 = math.exp %160 : vector<4x16x16xf32>
    %cst_67 = arith.constant dense<0.000000e+00> : vector<4x16xf32>
    %162 = vector.multi_reduction <add>, %161, %cst_67 [2] : vector<4x16x16xf32> to vector<4x16xf32>
    %163 = vector.shape_cast %162 : vector<4x16xf32> to vector<4x16x1xf32>
    %164 = arith.truncf %161 : vector<4x16x16xf32> to vector<4x16x16xbf16>
    %165 = arith.truncf %150 : vector<4x16x32xf32> to vector<4x16x32xbf16>
    "tpu.trace_start"() <{level = 10 : i32, message = "hqk,hkf->hqf"}> : () -> ()
    %cst_68 = arith.constant dense<0.000000e+00> : vector<4x16x32xf32>
    %166 = tpu.matmul %164, %165, %cst_68 {dimension_numbers = #tpu.dot_dimension_numbers<[2], [1], [1], [2], [0, 0, 0, 1, 1, 2], [0], [0]>} : vector<4x16x16xbf16>, vector<4x16x32xbf16>, vector<4x16x32xf32> -> vector<4x16x32xf32>
    "tpu.trace_stop"() : () -> ()
    %167 = tpu.reciprocal %163 : vector<4x16x1xf32> -> vector<4x16x1xf32>
    %168 = vector.broadcast %167 : vector<4x16x1xf32> to vector<4x16x32xf32>
    %169 = arith.mulf %166, %168 : vector<4x16x32xf32>
    %cst_69 = arith.constant dense<0.000000e+00> : vector<16x32xf32>
    %170 = vector.multi_reduction <add>, %169, %cst_69 [0] : vector<4x16x32xf32> to vector<16x32xf32>
    %171 = arith.truncf %132 : vector<16x32xf32> to vector<16x32xbf16>
    %c1_70 = arith.constant 1 : index
    %c0_71 = arith.constant 0 : index
    %c0_72 = arith.constant 0 : index
    %172 = vector.load %arg4[%c1_70, %c0_71, %c0_72] : memref<2x160x128xbf16, #tpu.memory_space<vmem>>, vector<1x32x128xbf16>
    %173 = vector.shape_cast %172 : vector<1x32x128xbf16> to vector<32x128xbf16>
    %cst_73 = arith.constant dense<0.000000e+00> : vector<16x128xf32>
    %174 = tpu.matmul %171, %173, %cst_73 {dimension_numbers = #tpu.dot_dimension_numbers<[1], [0], [0], [1], [0, 0, 1, 1], [], []>} : vector<16x32xbf16>, vector<32x128xbf16>, vector<16x128xf32> -> vector<16x128xf32>
    %175 = vector.broadcast %110 : vector<1x128xf32> to vector<16x128xf32>
    %176 = arith.addf %174, %175 : vector<16x128xf32>
    %177 = arith.mulf %176, %176 : vector<16x128xf32>
    %178 = arith.mulf %176, %177 : vector<16x128xf32>
    %cst_74 = arith.constant 4.471500e-02 : f32
    %179 = vector.broadcast %cst_74 : f32 to vector<16x128xf32>
    %180 = arith.mulf %179, %178 : vector<16x128xf32>
    %181 = arith.addf %176, %180 : vector<16x128xf32>
    %cst_75 = arith.constant 0.797884583 : f32
    %182 = vector.broadcast %cst_75 : f32 to vector<16x128xf32>
    %183 = arith.mulf %182, %181 : vector<16x128xf32>
    %184 = math.tanh %183 : vector<16x128xf32>
    %cst_76 = arith.constant 1.000000e+00 : f32
    %185 = vector.broadcast %cst_76 : f32 to vector<16x128xf32>
    %186 = arith.addf %185, %184 : vector<16x128xf32>
    %cst_77 = arith.constant 5.000000e-01 : f32
    %187 = vector.broadcast %cst_77 : f32 to vector<16x128xf32>
    %188 = arith.mulf %187, %186 : vector<16x128xf32>
    %189 = arith.mulf %176, %188 : vector<16x128xf32>
    %190 = arith.truncf %189 : vector<16x128xf32> to vector<16x128xbf16>
    %c1_78 = arith.constant 1 : index
    %c32_79 = arith.constant 32 : index
    %c0_80 = arith.constant 0 : index
    %191 = vector.load %arg4[%c1_78, %c32_79, %c0_80] : memref<2x160x128xbf16, #tpu.memory_space<vmem>>, vector<1x128x32xbf16>
    %192 = vector.shape_cast %191 : vector<1x128x32xbf16> to vector<128x32xbf16>
    %cst_81 = arith.constant dense<0.000000e+00> : vector<16x32xf32>
    %193 = tpu.matmul %190, %192, %cst_81 {dimension_numbers = #tpu.dot_dimension_numbers<[1], [0], [0], [1], [0, 0, 1, 1], [], []>} : vector<16x128xbf16>, vector<128x32xbf16>, vector<16x32xf32> -> vector<16x32xf32>
    %194 = vector.broadcast %112 : vector<1x32xf32> to vector<16x32xf32>
    %195 = arith.addf %193, %194 : vector<16x32xf32>
    %196 = arith.addf %104, %170 : vector<16x32xf32>
    %197 = arith.addf %196, %195 : vector<16x32xf32>
    %cst_82 = arith.constant dense<0.000000e+00> : vector<16xf32>
    %198 = vector.multi_reduction <add>, %197, %cst_82 [1] : vector<16x32xf32> to vector<16xf32>
    %199 = vector.shape_cast %198 : vector<16xf32> to vector<16x1xf32>
    %cst_83 = arith.constant 3.200000e+01 : f32
    %200 = vector.broadcast %cst_83 : f32 to vector<16x1xf32>
    %201 = arith.divf %199, %200 : vector<16x1xf32>
    %202 = vector.broadcast %201 : vector<16x1xf32> to vector<16x32xf32>
    %203 = arith.subf %197, %202 : vector<16x32xf32>
    %204 = arith.mulf %203, %203 : vector<16x32xf32>
    %cst_84 = arith.constant dense<0.000000e+00> : vector<16xf32>
    %205 = vector.multi_reduction <add>, %204, %cst_84 [1] : vector<16x32xf32> to vector<16xf32>
    %206 = vector.shape_cast %205 : vector<16xf32> to vector<16x1xf32>
    %cst_85 = arith.constant 3.200000e+01 : f32
    %207 = vector.broadcast %cst_85 : f32 to vector<16x1xf32>
    %208 = arith.divf %206, %207 : vector<16x1xf32>
    %cst_86 = arith.constant 9.99999974E-6 : f32
    %209 = vector.broadcast %cst_86 : f32 to vector<16x1xf32>
    %210 = arith.addf %208, %209 : vector<16x1xf32>
    %211 = math.rsqrt %210 : vector<16x1xf32>
    %212 = vector.broadcast %211 : vector<16x1xf32> to vector<16x32xf32>
    %213 = arith.mulf %203, %212 : vector<16x32xf32>
    %c0_87 = arith.constant 0 : index
    %c0_88 = arith.constant 0 : index
    %214 = vector.load %arg6[%c0_87, %c0_88] : memref<33x128xf32, #tpu.memory_space<vmem>>, vector<32x128xf32>
    %215 = arith.truncf %214 : vector<32x128xf32> to vector<32x128xbf16>
    %c32_89 = arith.constant 32 : index
    %c0_90 = arith.constant 0 : index
    %216 = vector.load %arg6[%c32_89, %c0_90] : memref<33x128xf32, #tpu.memory_space<vmem>>, vector<1x128xf32>
    %217 = arith.truncf %213 : vector<16x32xf32> to vector<16x32xbf16>
    %cst_91 = arith.constant dense<0.000000e+00> : vector<16x128xf32>
    %218 = tpu.matmul %217, %215, %cst_91 {dimension_numbers = #tpu.dot_dimension_numbers<[1], [0], [0], [1], [0, 0, 1, 1], [], []>} : vector<16x32xbf16>, vector<32x128xbf16>, vector<16x128xf32> -> vector<16x128xf32>
    %219 = vector.broadcast %216 : vector<1x128xf32> to vector<16x128xf32>
    %220 = arith.addf %218, %219 : vector<16x128xf32>
    %c0_92 = arith.constant 0 : index
    %c0_93 = arith.constant 0 : index
    %221 = vector.load %arg7[%c0_92, %c0_93] : memref<16x128xf32, #tpu.memory_space<vmem>>, vector<16x128xf32>
    tpu.vector_store %arg7[%c0_92, %c0_93], %220 {strides = array<i32>} : memref<16x128xf32, #tpu.memory_space<vmem>>, vector<16x128xf32>,
    return
  }
}

</mosaic_0001>

<bundles_post_ra>
// kernel: gptj_forward.1
= control target key start
LH: loop header
LB: loop body
LE: loop exit
PB: predicated region body
PF: predicated region fallthrough
CT: control target
= control target key end

     0   :  { %12 = vsyncpa [#allocation3], 0  ;;  %s3749_s0 = inlined_call_operand.vmem [shape: f32[16,32], index: 0, kind: input, shape index: {}]   ;;  %s3750_s1 = inlined_call_operand.hbm [shape: f32[16,16], index: 1, kind: input, shape index: {}]   ;;  %s3751_s2 = inlined_call_operand.vmem [shape: f32[2,16,8], index: 2, kind: input, shape index: {}]   ;;  %s3752_s3 = inlined_call_operand.vmem [shape: bf16[2,4,32,64], index: 3, kind: input, shape index: {}]   ;;  %s3753_s4 = inlined_call_operand.vmem [shape: bf16[2,160,128], index: 4, kind: input, shape index: {}]   ;;  %s3754_s5 = inlined_call_operand.hbm [shape: f32[2,4,128], index: 5, kind: input, shape index: {}]   ;;  %s3755_s6 = inlined_call_operand.vmem [shape: f32[33,128], index: 6, kind: input, shape index: {}]   ;;  %s3756_s7 = inlined_call_operand.vmem [shape: f32[16,128], index: 7, kind: output, shape index: {}]  }
   0x1   :  { %13 = vsyncpa [#allocation5], 0  ;;  %s2963_s24 = smov [#allocation2]   ;;  %s2915_s28 = scalar_lea.hbm %s3750_s1, 256 }
   0x2   :  { %s21_s25 = sshll.u32 %s2963_s24, 4  ;;  %p2916_p0 = scmp.ne.s32.totalorder %s3750_s1, %s2915_s28  ;;  %s22_s25 = int_to_ptr.vmem [resolvable:$true] %s21_s25 }
   0x3   :  { %p2919_p1 = scmp.lt.u32.totalorder %s2915_s28, %s3750_s1 }
   0x5   :  { %p2921_p2 = pnand %p2919_p1, %p2916_p0 }
   0x7   :  { %2924 = shalt.err (!%p2921_p2)
}
   0x8   :  { %s2925_s10 = scalar_lea.vmem %s22_s25, 256  ;;  %p2930_p4 = scmp.lt.s32.totalorder %s22_s25, %s22_s25 }
   0x9   :  { %p2926_p3 = scmp.ne.s32.totalorder %s22_s25, %s2925_s10  ;;  %p2931_p5 = scmp.lt.s32.totalorder %s2925_s10, %s2925_s10 }
   0xb   :  { %p2932_p6 = por %p2931_p5, %p2930_p4 }
   0xd   :  { %p2933_p7 = pnand %p2932_p6, %p2926_p3 }
   0xf   :  { %2936 = shalt.err (!%p2933_p7)
}
  0x10   :  { %s2964_s11 = smov 128   ;;  %s2965_s12 = smov 8  }
  0x11   :  { %27 = dma.hbm_to_vmem [thread:$0]  %s3750_s1, 256, %s22_s25, [#allocation3], %s2964_s11, %s2964_s11, %s2965_s12  }
  0x12   :  { %s2966_s15 = smov [#allocation4]   ;;  %s2937_s19 = scalar_lea.hbm %s3754_s5, 128 }
  0x13   :  { %s39_s16 = sshll.u32 %s2966_s15, 4  ;;  %p2938_p8 = scmp.ne.s32.totalorder %s3754_s5, %s2937_s19  ;;  %s40_s16 = int_to_ptr.vmem [resolvable:$true] %s39_s16 }
  0x14   :  { %p2941_p9 = scmp.lt.u32.totalorder %s2937_s19, %s3754_s5 }
  0x16   :  { %p2943_p10 = pnand %p2941_p9, %p2938_p8 }
  0x18   :  { %2946 = shalt.err (!%p2943_p10)
}
  0x19   :  { %s2947_s24 = scalar_lea.vmem %s40_s16, 128  ;;  %p2952_p12 = scmp.lt.s32.totalorder %s40_s16, %s40_s16 }
  0x1a   :  { %p2948_p11 = scmp.ne.s32.totalorder %s40_s16, %s2947_s24  ;;  %p2953_p13 = scmp.lt.s32.totalorder %s2947_s24, %s2947_s24 }
  0x1c   :  { %p2954_p0 = por %p2953_p13, %p2952_p12 }
  0x1e   :  { %p2955_p1 = pnand %p2954_p0, %p2948_p11 }
  0x20   :  { %2958 = shalt.err (!%p2955_p1)
}
  0x21   :  { %s2967_s1 = smov 64   ;;  %s2968_s25 = smov 4  }
  0x22   :  { %45 = dma.hbm_to_vmem [thread:$0]  %s3754_s5, 128, %s40_s16, [#allocation5], %s2967_s1, %s2967_s1, %s2968_s25  }
  0x23   :  { %2959 = dma.done.wait [#allocation3], 256  }
  0x24   :  { %2960 = vsyncadd [#allocation3], 4294967040 }
  0x25   :  { %2961 = dma.done.wait [#allocation5], 128  }
  0x26   :  { %2962 = vsyncadd [#allocation5], 4294967168  ;;  %vm68_vm0 = vcmask 261120   ;;  %v55_v0 = vld [vmem:[%s3749_s0] sm:$0xff]  ;;  %v56_v1 = vld [vmem:[%s3749_s0 + $0x8] sm:$0xff]  ;;  %v2969_v16 = vmov 0.0  }
  0x27   :  { %v69_v2 = vsel %vm68_vm0, %v55_v0, 0.0  ;;  %v72_v3 = vsel %vm68_vm0, %v56_v1, 0.0  ;;  %v2791_v14 = vld [vmem:[%s3752_s3] sm:$0xff]   ;;  %2554 = vmatprep.subr.bf16.mxu1 %v2969_v16  ;;  %2570 = vmatprep.subr.bf16.mxu0 %v2969_v16  ;;  %v2793_v17 = vld [vmem:[%s3752_s3 + $0x8] sm:$0xff]   ;;  %vm2970_vm1 = vmmov 0   ;;  %v3076_v19 = vld [vmem:[%s3751_s2 + $0x18] sm:$0xff] }
  0x28   :  { %70 = vadd.xlane.f32.xlu0 %v69_v2  ;;  %v2792_v15 = vld [vmem:[%s3752_s3 + $0x20] sm:$0xff]   ;;  %2555 = vmatpush3.bf16.msra.mxu1 %v2791_v14  ;;  %v2794_v18 = vld [vmem:[%s3752_s3 + $0x28] sm:$0xff]   ;;  %v3081_v20 = vld [vmem:[%s3751_s2 + $0x10] sm:$0xff]  ;;  %s2971_s21 = smov 24   ;;  %s2972_s24 = smov 16   ;;  %vm485_vm2 = vcmask 64512  }
  0x29   :  { %2571 = vmatpush3.bf16.msra.mxu0 %v2792_v15  ;;  %2556 = vmatprep.subr.bf16.mxu1 %v2969_v16  ;;  %v3088_v21 = vld [vmem:[%s3751_s2] sm:$0xff]  ;;  %v3094_v22 = vld [vmem:[%s3751_s2 + $0x8] sm:$0xff]  ;;  %v2363_v31 = vld [vmem:[#allocation4] ss:$0 sm:$0xff]  ;;  %s2973_s10 = smov 120   ;;  %vm683_vm3 = vcmask 130048  }
  0x2a   :  { %2572 = vmatprep.subr.bf16.mxu0 %v2969_v16  ;;  %2558 = vmatprep.mubr.msk.bf16.mxu1 %vm2970_vm1, %v2969_v16  ;;  %v2364_v35 = vld [vmem:[#allocation4 + $0x1] ss:$0 sm:$0xff]  ;;  %v2796_v41 = vld [vmem:[%s3752_s3 + $0x18] sm:$0xff]   ;;  %s2975_s11 = smov 96  }
  0x2b   :  { %2574 = vmatprep.mubr.msk.bf16.mxu0 %vm2970_vm1, %v2969_v16  ;;  %v2795_v39 = vld [vmem:[%s3752_s3 + $0x10] sm:$0xff]   ;;  %v2798_v43 = vld [vmem:[%s3752_s3 + $0x38] sm:$0xff]  }
  0x2c   :  { %73 = vadd.xlane.f32.xlu0 %v72_v3  ;;  %2557 = vmatpush3.bf16.msra.mxu1 %v2793_v17  ;;  %v2797_v42 = vld [vmem:[%s3752_s3 + $0x30] sm:$0xff]  }
  0x2d   :  { %2573 = vmatpush3.bf16.msra.mxu0 %v2794_v18  ;;  %2562 = vmatprep.subr.bf16.mxu1 %v2969_v16 }
  0x2e   :  { %2586 = vmatprep.subr.bf16.mxu0 %v2969_v16 }
  0x42   :  { %420 = vrot.lane.b32.xlu0 %v3081_v20, %s2971_s21 }
  0xb5   :  { %v71_v4 = vpop.xlane.xlu0 %70 }
  0xb6   :  { %v76_v5 = vmul.f32 0.03125, %v71_v4 }
  0xb8   :  { %v78_v6 = vsub.f32 %v55_v0, %v76_v5 }
  0xb9   :  { %v74_v7 = vpop.xlane.xlu0 %73 }
  0xba   :  { %v77_v8 = vmul.f32 0.03125, %v74_v7  ;;  %v80_v9 = vmul.f32 %v78_v6, %v78_v6 }
  0xbc   :  { %v79_v10 = vsub.f32 %v56_v1, %v77_v8  ;;  %v82_v11 = vsel %vm68_vm0, %v80_v9, 0.0 }
  0xbd   :  { %83 = vadd.xlane.f32.xlu1 %v82_v11  ;;  %v3131_v44 = vpop.permute.xlu0 %420 }
  0xbe   :  { %v81_v12 = vmul.f32 %v79_v10, %v79_v10 }
  0xc0   :  { %v85_v13 = vsel %vm68_vm0, %v81_v12, 0.0 }
  0xc1   :  { %86 = vadd.xlane.f32.xlu1 %v85_v13 }
  0xd2   :  { %422 = vrot.lane.b32.xlu1 %v3076_v19, %s2971_s21 }
  0xd6   :  { %406 = vrot.lane.b32.xlu1 %v3088_v21, %s2972_s24 }
  0xda   :  { %408 = vrot.lane.b32.xlu1 %v3094_v22, %s2972_s24 }
 0x14a   :  { %v84_v23 = vpop.xlane.xlu1 %83 }
 0x14b   :  { %v88_v24 = vmul.f32 0.03125, %v84_v23 }
 0x14d   :  { %v90_v25 = vadd.f32 1e-05, %v88_v24 }
 0x14e   :  { %v87_v26 = vpop.xlane.xlu1 %86 }
 0x14f   :  { %2827 = vrsqrt.f32 %v90_v25  ;;  %v89_v27 = vmul.f32 0.03125, %v87_v26 }
 0x151   :  { %v91_v28 = vadd.f32 1e-05, %v89_v27 }
 0x152   :  { %v3133_v45 = vpop.permute.xlu1 %422 }
 0x153   :  { %2829 = vrsqrt.f32 %v91_v28 }
 0x159   :  { %v2828_v29 = vpop.eup %2827 }
 0x15a   :  { %v94_v30 = vmul.f32 %v2828_v29, %v78_v6  ;;  %v3175_v6 = vpop.permute.xlu1 %406 }
 0x15c   :  { %v100_v33 = vmul.f32 %v2363_v31, %v94_v30 }
 0x15d   :  { %v2830_v32 = vpop.eup %2829 }
 0x15e   :  { %v95_v34 = vmul.f32 %v2830_v32, %v79_v10  ;;  %v106_v37 = vadd.f32 %v2364_v35, %v100_v33  ;;  %v3177_v7 = vpop.permute.xlu1 %408 }
 0x160   :  { %v101_v36 = vmul.f32 %v2363_v31, %v95_v34 }
 0x162   :  { %v107_v38 = vadd.f32 %v2364_v35, %v101_v36 }
 0x164   :  { %v3100_v40 = vpack.c.bf16 %v107_v38, %v106_v37 }
 0x166   :  { %2559 = vmatmul.mubr.msk.bf16.vlgmr.msra.gmra.mrb[0].mxu1 %vm68_vm0, %v3100_v40  ;;  %2575 = vmatmul.mubr.msk.bf16.vlgmr.msra.gmra.mrb[0].mxu0 %vm68_vm0, %v3100_v40 }
 0x167   :  { %2563 = vmatpush3.bf16.msra.mxu1 %v2795_v39  ;;  %2566 = vmatprep.mubr.msk.bf16.mxu1 %vm2970_vm1, %v2969_v16 }
 0x168   :  { %2564 = vmatprep.subr.bf16.mxu1 %v2969_v16  ;;  %2588 = vmatprep.mubr.msk.bf16.mxu0 %vm2970_vm1, %v2969_v16 }
 0x16b   :  { %2565 = vmatpush3.bf16.msra.mxu1 %v2796_v41 }
 0x16c   :  { %2578 = vmatprep.subr.bf16.mxu1 %v2969_v16 }
 0x16e   :  { %2567 = vmatmul.mubr.msk.bf16.vlgmr.msra.gmra.mrb[4].mxu1 %vm68_vm0, %v3100_v40 }
 0x16f   :  { %2579 = vmatpush3.bf16.msra.mxu1 %v2797_v42  ;;  %2582 = vmatprep.mubr.msk.bf16.mxu1 %vm2970_vm1, %v2969_v16 }
 0x170   :  { %2580 = vmatprep.subr.bf16.mxu1 %v2969_v16 }
 0x173   :  { %2581 = vmatpush3.bf16.msra.mxu1 %v2798_v43 }
 0x174   :  { %2592 = vmatprep.subr.bf16.mxu1 %v2969_v16 }
 0x176   :  { %2583 = vmatmul.mubr.msk.bf16.vlgmr.msra.gmra.mrb[8].mxu1 %vm68_vm0, %v3100_v40 }
 0x177   :  { %2594 = vmatprep.mubr.msk.bf16.mxu1 %vm2970_vm1, %v2969_v16 }
 0x239   :  { %v3135_v46 = vpop.f32.mrb[0].mxu1  ;;  %v3137_v47 = vpop.f32.mrb[0].mxu0 }
 0x23a   :  { %v2560_v48 = vpop.f32.mrb[1].mxu1  ;;  %v2576_v49 = vpop.f32.mrb[1].mxu0  ;;  %v426_v50 = vmul.f32 %v3131_v44, %v3135_v46  ;;  %v430_v60 = vmul.f32 %v3131_v44, %v3137_v47  ;;  %v412_v9 = vmul.f32 %v3175_v6, %v3135_v46  ;;  %v340_v39 = vmul.f32 %v3135_v46, %v3088_v21 }
 0x23b   :  { %v3141_v51 = vpop.f32.mrb[2].mxu1  ;;  %v3143_v52 = vpop.f32.mrb[2].mxu0 }
 0x23c   :  { %v2561_v53 = vpop.f32.mrb[3].mxu1  ;;  %v2577_v54 = vpop.f32.mrb[3].mxu0  ;;  %442 = vrot.lane.b32.xlu0 %v426_v50, %s2973_s10  ;;  %v427_v55 = vmul.f32 %v3133_v45, %v3141_v51  ;;  %v762_v56 = vpack.c.bf16 %v3143_v52, %v3137_v47  ;;  %v760_v57 = vpack.c.bf16 %v3141_v51, %v3135_v46  ;;  %v431_v63 = vmul.f32 %v3133_v45, %v3143_v52 }
 0x23d   :  { %v413_v10 = vmul.f32 %v3177_v7, %v3141_v51  ;;  %v417_v23 = vmul.f32 %v3177_v7, %v3143_v52  ;;  %v341_v41 = vmul.f32 %v3141_v51, %v3094_v22 }
 0x23e   :  { %444 = vrot.lane.b32.xlu1 %v427_v55, %s2973_s10  ;;  %v344_v55 = vmul.f32 %v3137_v47, %v3088_v21 }
 0x240   :  { %350 = vrot.lane.b32.xlu0 %v3081_v20, %s2965_s12  ;;  %v416_v20 = vmul.f32 %v3175_v6, %v3137_v47 }
 0x241   :  { %v3155_v58 = vpop.f32.mrb[4].mxu1 }
 0x242   :  { %v2568_v59 = vpop.f32.mrb[5].mxu1  ;;  %352 = vrot.lane.b32.xlu1 %v3076_v19, %s2965_s12  ;;  %s2974_s12 = smov 112   ;;  %v428_v30 = vmul.f32 %v3131_v44, %v3155_v58 }
 0x243   :  { %v3161_v61 = vpop.f32.mrb[6].mxu1  ;;  %v345_v59 = vmul.f32 %v3143_v52, %v3094_v22 }
 0x244   :  { %v2569_v62 = vpop.f32.mrb[7].mxu1  ;;  %450 = vrot.lane.b32.xlu0 %v430_v60, %s2973_s10  ;;  %v761_v0 = vpack.c.bf16 %v3161_v61, %v3155_v58  ;;  %v429_v33 = vmul.f32 %v3133_v45, %v3161_v61 }
 0x246   :  { %452 = vrot.lane.b32.xlu1 %v431_v63, %s2973_s10 }
 0x249   :  { %v3169_v1 = vpop.f32.mrb[8].mxu1 }
 0x24a   :  { %v2584_v2 = vpop.f32.mrb[9].mxu1  ;;  %v432_v32 = vmul.f32 %v3131_v44, %v3169_v1 }
 0x24b   :  { %v3171_v3 = vpop.f32.mrb[10].mxu1 }
 0x24c   :  { %v2585_v4 = vpop.f32.mrb[11].mxu1  ;;  %v763_v5 = vpack.c.bf16 %v3171_v3, %v3169_v1  ;;  %v433_v34 = vmul.f32 %v3133_v45, %v3171_v3 }
 0x2ae   :  { %v443_v8 = vpop.permute.xlu0 %442 }
 0x2af   :  { %v466_v12 = vadd.f32 %v443_v8, %v412_v9  ;;  %v414_v8 = vmul.f32 %v3175_v6, %v3155_v58  ;;  %v415_v9 = vmul.f32 %v3177_v7, %v3161_v61 }
 0x2b0   :  { %v445_v11 = vpop.permute.xlu1 %444 }
 0x2b1   :  { %v467_v13 = vadd.f32 %v445_v11, %v413_v10 }
 0x2b2   :  { %v3183_v14 = vpop.permute.xlu0 %350 }
 0x2b3   :  { %v478_v15 = vpack.c.bf16 %v467_v13, %v466_v12  ;;  %v356_v17 = vmul.f32 %v3183_v14, %v3135_v46  ;;  %v360_v29 = vmul.f32 %v3183_v14, %v3137_v47  ;;  %v358_v35 = vmul.f32 %v3183_v14, %v3155_v58 }
 0x2b4   :  { %v3187_v18 = vpop.permute.xlu1 %352 }
 0x2b5   :  { %483 = vrot.lane.b32.xlu0 %v478_v15, %s2974_s12  ;;  %372 = vrot.lane.b32.xlu1 %v356_v17, %s2973_s10  ;;  %v357_v24 = vmul.f32 %v3187_v18, %v3141_v51  ;;  %v361_v31 = vmul.f32 %v3187_v18, %v3143_v52  ;;  %v418_v17 = vmul.f32 %v3175_v6, %v3169_v1 }
 0x2b6   :  { %v451_v19 = vpop.permute.xlu0 %450 }
 0x2b7   :  { %v470_v26 = vadd.f32 %v451_v19, %v416_v20  ;;  %v419_v19 = vmul.f32 %v3177_v7, %v3171_v3 }
 0x2b8   :  { %v453_v25 = vpop.permute.xlu1 %452 }
 0x2b9   :  { %v471_v27 = vadd.f32 %v453_v25, %v417_v23  ;;  %374 = vrot.lane.b32.xlu0 %v357_v24, %s2973_s10 }
 0x2bb   :  { %v480_v28 = vpack.c.bf16 %v471_v27, %v470_v26  ;;  %v359_v26 = vmul.f32 %v3187_v18, %v3161_v61  ;;  %v362_v27 = vmul.f32 %v3183_v14, %v3169_v1 }
 0x2bd   :  { %380 = vrot.lane.b32.xlu0 %v360_v29, %s2973_s10  ;;  %584 = vrot.lane.b32.xlu1 %v480_v28, %s2974_s12  ;;  %v363_v28 = vmul.f32 %v3187_v18, %v3171_v3 }
 0x2c1   :  { %446 = vrot.lane.b32.xlu0 %v428_v30, %s2973_s10  ;;  %382 = vrot.lane.b32.xlu1 %v361_v31, %s2973_s10 }
 0x2c5   :  { %454 = vrot.lane.b32.xlu0 %v432_v32, %s2973_s10  ;;  %448 = vrot.lane.b32.xlu1 %v429_v33, %s2973_s10  ;;  %v342_v32 = vmul.f32 %v3155_v58, %v3088_v21  ;;  %v343_v33 = vmul.f32 %v3161_v61, %v3094_v22 }
 0x2c9   :  { %456 = vrot.lane.b32.xlu1 %v433_v34, %s2973_s10 }
 0x2cd   :  { %376 = vrot.lane.b32.xlu1 %v358_v35, %s2973_s10 }
 0x327   :  { %v484_v36 = vpop.permute.xlu0 %483  ;;  %v373_v38 = vpop.permute.xlu1 %372 }
 0x328   :  { %v490_v37 = vsel %vm485_vm2, %v484_v36, 0  ;;  %v396_v43 = vadd.f32 %v373_v38, %v340_v39  ;;  %v347_v39 = vmul.f32 %v3171_v3, %v3094_v22 }
 0x329   :  { %2587 = vmatpush3.bf16.xpose.msra.mxu0 %v490_v37 }
 0x32a   :  { %2598 = vmatprep.subr.bf16.mxu0 %v2969_v16 }
 0x32b   :  { %v375_v42 = vpop.permute.xlu0 %374 }
 0x32c   :  { %v397_v48 = vadd.f32 %v375_v42, %v341_v41  ;;  %v346_v41 = vmul.f32 %v3169_v1, %v3088_v21  ;;  %v3275_v21 = vld [vmem:[#allocation2] sm:$0xff]  ;;  %v2800_v1 = vld [vmem:[%s3753_s4 + $0x8] sm:$0xff]  }
 0x32e   :  { %v474_v49 = vpack.c.bf16 %v397_v48, %v396_v43 }
 0x32f   :  { %v585_v50 = vpop.permute.xlu1 %584  ;;  %v381_v53 = vpop.permute.xlu0 %380 }
 0x330   :  { %v590_v54 = vsel %vm485_vm2, %v585_v50, 0  ;;  %2589 = vmatmul.mubr.msk.bf16.vlgmr.msra.gmra.mrb[4].mxu0 %vm485_vm2, %v474_v49  ;;  %v400_v63 = vadd.f32 %v381_v53, %v344_v55 }
 0x331   :  { %2599 = vmatpush3.bf16.xpose.msra.mxu0 %v590_v54  ;;  %2600 = vmatprep.mubr.msk.bf16.mxu0 %vm2970_vm1, %v2969_v16  ;;  %v3277_v54 = vld [vmem:[#allocation2 + $0x8] sm:$0xff] }
 0x332   :  { %2610 = vmatprep.subr.bf16.mxu0 %v2969_v16 }
 0x333   :  { %v383_v60 = vpop.permute.xlu1 %382  ;;  %v447_v62 = vpop.permute.xlu0 %446 }
 0x334   :  { %v401_v2 = vadd.f32 %v383_v60, %v345_v59  ;;  %v468_v11 = vadd.f32 %v447_v62, %v414_v8 }
 0x336   :  { %v476_v4 = vpack.c.bf16 %v401_v2, %v400_v63 }
 0x337   :  { %v449_v10 = vpop.permute.xlu1 %448  ;;  %v455_v13 = vpop.permute.xlu0 %454 }
 0x338   :  { %v469_v12 = vadd.f32 %v449_v10, %v415_v9  ;;  %2601 = vmatmul.mubr.msk.bf16.vlgmr.msra.gmra.mrb[8].mxu0 %vm485_vm2, %v476_v4  ;;  %v472_v23 = vadd.f32 %v455_v13, %v418_v17 }
 0x339   :  { %2612 = vmatprep.mubr.msk.bf16.mxu0 %vm2970_vm1, %v2969_v16 }
 0x33a   :  { %v479_v15 = vpack.c.bf16 %v469_v12, %v468_v11 }
 0x33b   :  { %v457_v20 = vpop.permute.xlu1 %456 }
 0x33c   :  { %v473_v24 = vadd.f32 %v457_v20, %v419_v19  ;;  %534 = vrot.lane.b32.xlu0 %v479_v15, %s2974_s12 }
 0x33e   :  { %v481_v25 = vpack.c.bf16 %v473_v24, %v472_v23 }
 0x33f   :  { %v377_v29 = vpop.permute.xlu1 %376 }
 0x340   :  { %378 = vrot.lane.b32.xlu0 %v359_v26, %s2973_s10  ;;  %634 = vrot.lane.b32.xlu1 %v481_v25, %s2974_s12  ;;  %v398_v36 = vadd.f32 %v377_v29, %v342_v32 }
 0x344   :  { %384 = vrot.lane.b32.xlu0 %v362_v27, %s2973_s10  ;;  %386 = vrot.lane.b32.xlu1 %v363_v28, %s2973_s10 }
 0x3ae   :  { %v535_v30 = vpop.permute.xlu0 %534 }
 0x3af   :  { %v540_v31 = vsel %vm485_vm2, %v535_v30, 0 }
 0x3b0   :  { %2593 = vmatpush3.bf16.xpose.msra.mxu1 %v540_v31 }
 0x3b1   :  { %2604 = vmatprep.subr.bf16.mxu1 %v2969_v16 }
 0x3b2   :  { %v635_v34 = vpop.permute.xlu1 %634  ;;  %v379_v35 = vpop.permute.xlu0 %378 }
 0x3b3   :  { %v399_v37 = vadd.f32 %v379_v35, %v343_v33  ;;  %v640_v48 = vsel %vm485_vm2, %v635_v34, 0 }
 0x3b5   :  { %v475_v38 = vpack.c.bf16 %v399_v37, %v398_v36 }
 0x3b6   :  { %v387_v42 = vpop.permute.xlu1 %386  ;;  %v385_v43 = vpop.permute.xlu0 %384 }
 0x3b7   :  { %v403_v49 = vadd.f32 %v387_v42, %v347_v39  ;;  %v402_v50 = vadd.f32 %v385_v43, %v346_v41  ;;  %2595 = vmatmul.mubr.msk.bf16.vlgmr.msra.gmra.mrb[12].mxu1 %vm485_vm2, %v475_v38 }
 0x3b8   :  { %2605 = vmatpush3.bf16.xpose.msra.mxu1 %v640_v48  ;;  %2606 = vmatprep.mubr.msk.bf16.mxu1 %vm2970_vm1, %v2969_v16 }
 0x3b9   :  { %v477_v53 = vpack.c.bf16 %v403_v49, %v402_v50  ;;  %2616 = vmatprep.subr.bf16.mxu1 %v2969_v16 }
 0x3bf   :  { %2607 = vmatmul.mubr.msk.bf16.vlgmr.msra.gmra.mrb[16].mxu1 %vm485_vm2, %v477_v53 }
 0x3c0   :  { %2618 = vmatprep.mubr.msk.bf16.mxu1 %vm2970_vm1, %v2969_v16 }
 0x403   :  { %v526_v22 = vpop.f32.mrb[4].mxu0 }
 0x404   :  { %v527_v55 = vadd.f32 %v526_v22, %v3275_v21  ;;  %v2590_v59 = vpop.f32.mrb[5].mxu0 }
 0x405   :  { %v529_v60 = vpop.f32.mrb[6].mxu0 }
 0x406   :  { %v530_v62 = vadd.f32 %v529_v60, %v3277_v54  ;;  %v2591_v63 = vpop.f32.mrb[7].mxu0  ;;  %v684_v2 = vsel %vm683_vm3, %v527_v55, -inf  ;;  %v2799_v60 = vld [vmem:[%s3753_s4] sm:$0xff]  }
 0x407   :  { %685 = vmax.xlane.f32.xlu0 %v684_v2 }
 0x408   :  { %v687_v4 = vsel %vm683_vm3, %v530_v62, -inf }
 0x409   :  { %688 = vmax.xlane.f32.xlu1 %v687_v4 }
 0x40b   :  { %v626_v8 = vpop.f32.mrb[8].mxu0 }
 0x40c   :  { %v627_v9 = vadd.f32 %v626_v8, %v3275_v21  ;;  %v2602_v10 = vpop.f32.mrb[9].mxu0 }
 0x40d   :  { %v629_v11 = vpop.f32.mrb[10].mxu0 }
 0x40e   :  { %v630_v12 = vadd.f32 %v629_v11, %v3277_v54  ;;  %v2603_v13 = vpop.f32.mrb[11].mxu0  ;;  %v696_v15 = vsel %vm683_vm3, %v627_v9, -inf }
 0x40f   :  { %697 = vmax.xlane.f32.xlu0 %v696_v15 }
 0x410   :  { %v699_v17 = vsel %vm683_vm3, %v630_v12, -inf }
 0x413   :  { %700 = vmax.xlane.f32.xlu0 %v699_v17 }
 0x41a   :  { %861 = vrot.lane.b32.xlu1 %v762_v56, %s2975_s11 }
 0x429   :  { %765 = vrot.lane.b32.xlu0 %v760_v57, %s2975_s11 }
 0x48a   :  { %v576_v19 = vpop.f32.mrb[12].mxu1 }
 0x48b   :  { %v3296_v20 = vadd.f32 %v576_v19, %v3275_v21  ;;  %v2596_v23 = vpop.f32.mrb[13].mxu1 }
 0x48c   :  { %v579_v24 = vpop.f32.mrb[14].mxu1 }
 0x48d   :  { %v3299_v25 = vadd.f32 %v579_v24, %v3277_v54  ;;  %v2597_v26 = vpop.f32.mrb[15].mxu1  ;;  %v690_v27 = vsel %vm683_vm3, %v3296_v20, -inf }
 0x48e   :  { %691 = vmax.xlane.f32.xlu1 %v690_v27 }
 0x48f   :  { %v693_v47 = vsel %vm683_vm3, %v3299_v25, -inf }
 0x490   :  { %694 = vmax.xlane.f32.xlu0 %v693_v47 }
 0x492   :  { %v676_v46 = vpop.f32.mrb[16].mxu1 }
 0x493   :  { %v3306_v51 = vadd.f32 %v676_v46, %v3275_v21  ;;  %v2608_v52 = vpop.f32.mrb[17].mxu1 }
 0x494   :  { %v679_v56 = vpop.f32.mrb[18].mxu1  ;;  %v686_v57 = vpop.xlane.xlu0 %685 }
 0x495   :  { %v3309_v28 = vadd.f32 %v679_v56, %v3277_v54  ;;  %v708_v29 = vsub.f32 %v527_v55, %v686_v57  ;;  %v2609_v30 = vpop.f32.mrb[19].mxu1  ;;  %v702_v31 = vsel %vm683_vm3, %v3306_v51, -inf  ;;  %v2802_v57 = vld [vmem:[%s3753_s4 + $0x18] sm:$0xff]  }
 0x496   :  { %v689_v32 = vpop.xlane.xlu1 %688  ;;  %703 = vmax.xlane.f32.xlu0 %v702_v31  ;;  %v2805_v30 = vld [vmem:[%s3753_s4 + $0x30] sm:$0xff]   ;;  %v2806_v31 = vld [vmem:[%s3753_s4 + $0x38] sm:$0xff]  }
 0x497   :  { %v716_v33 = vmul.f32 1.442695, %v708_v29  ;;  %v709_v34 = vsub.f32 %v530_v62, %v689_v32  ;;  %v705_v35 = vsel %vm683_vm3, %v3309_v28, -inf  ;;  %v2804_v29 = vld [vmem:[%s3753_s4 + $0x28] sm:$0xff]   ;;  %v2807_v32 = vld [vmem:[%s3753_s4 + $0x40] sm:$0xff]  }
 0x498   :  { %706 = vmax.xlane.f32.xlu1 %v705_v35 }
 0x499   :  { %v718_v36 = vmul.f32 1.442695, %v709_v34  ;;  %2831 = vpow2.f32 %v716_v33  ;;  %v2808_v33 = vld [vmem:[%s3753_s4 + $0x48] sm:$0xff]  }
 0x49a   :  { %v862_v22 = vpop.permute.xlu1 %861 }
 0x49b   :  { %2833 = vpow2.f32 %v718_v36 }
 0x49c   :  { %v698_v37 = vpop.xlane.xlu0 %697 }
 0x49d   :  { %v712_v38 = vsub.f32 %v627_v9, %v698_v37 }
 0x49f   :  { %v724_v39 = vmul.f32 1.442695, %v712_v38 }
 0x4a0   :  { %v701_v41 = vpop.xlane.xlu0 %700 }
 0x4a1   :  { %v713_v42 = vsub.f32 %v630_v12, %v701_v41  ;;  %2835 = vpow2.f32 %v724_v39 }
 0x4a3   :  { %v726_v43 = vmul.f32 1.442695, %v713_v42  ;;  %v2832_v48 = vpop.eup %2831 }
 0x4a4   :  { %v766_v49 = vpop.permute.xlu0 %765  ;;  %v732_v61 = vsel %vm683_vm3, %v2832_v48, 0.0 }
 0x4a5   :  { %v2834_v50 = vpop.eup %2833  ;;  %2837 = vpow2.f32 %v726_v43  ;;  %2611 = vmatpush3.bf16.msra.mxu0 %v766_v49  ;;  %v2385_v43 = vld [vmem:[#allocation4 + $0x2] ss:$0 sm:$0xff] }
 0x4a6   :  { %v756_v53 = vpack.c.bf16 %v2834_v50, %v2832_v48  ;;  %2622 = vmatprep.subr.bf16.mxu0 %v2969_v16  ;;  %v735_v58 = vsel %vm683_vm3, %v2834_v50, 0.0 }
 0x4a8   :  { %2613 = vmatmul.mubr.msk.bf16.vlgmr.msra.gmra.mrb[12].mxu0 %vm683_vm3, %v756_v53 }
 0x4a9   :  { %909 = vrot.lane.b32.xlu1 %v763_v5, %s2975_s11  ;;  %2623 = vmatpush3.bf16.msra.mxu0 %v862_v22 }
 0x4aa   :  { %2624 = vmatprep.mubr.msk.bf16.mxu0 %vm2970_vm1, %v2969_v16  ;;  %2634 = vmatprep.subr.bf16.mxu0 %v2969_v16 }
 0x4ab   :  { %v2836_v55 = vpop.eup %2835 }
 0x4ac   :  { %813 = vrot.lane.b32.xlu0 %v761_v0, %s2975_s11 }
 0x4af   :  { %v2838_v59 = vpop.eup %2837 }
 0x4b0   :  { %v758_v62 = vpack.c.bf16 %v2838_v59, %v2836_v55  ;;  %v747_v26 = vsel %vm683_vm3, %v2838_v59, 0.0 }
 0x4b2   :  { %2625 = vmatmul.mubr.msk.bf16.vlgmr.msra.gmra.mrb[16].mxu0 %vm683_vm3, %v758_v62 }
 0x4b3   :  { %2635 = vmatpush3.bf16.msra.mxu0 %v2799_v60  ;;  %2638 = vmatprep.mubr.msk.bf16.mxu0 %vm2970_vm1, %v2969_v16 }
 0x4b4   :  { %2636 = vmatprep.subr.bf16.mxu0 %v2969_v16 }
 0x4b7   :  { %2637 = vmatpush3.bf16.msra.mxu0 %v2800_v1 }
 0x4b8   :  { %2662 = vmatprep.subr.bf16.mxu0 %v2969_v16 }
 0x4ba   :  { %2639 = vmatmul.mubr.msk.bf16.vlgmr.msra.gmra.mrb[20].mxu0 %vm68_vm0, %v3100_v40 }
 0x4bb   :  { %2666 = vmatprep.mubr.msk.bf16.mxu0 %vm2970_vm1, %v2969_v16 }
 0x4cb   :  { %736 = vadd.xlane.f32.xlu0 %v735_v58 }
 0x4cd   :  { %733 = vadd.xlane.f32.xlu1 %v732_v61 }
 0x51b   :  { %v692_v0 = vpop.xlane.xlu1 %691 }
 0x51c   :  { %v710_v3 = vsub.f32 %v3296_v20, %v692_v0 }
 0x51d   :  { %v695_v5 = vpop.xlane.xlu0 %694 }
 0x51e   :  { %v720_v63 = vmul.f32 1.442695, %v710_v3  ;;  %v711_v2 = vsub.f32 %v3299_v25, %v695_v5  ;;  %v744_v25 = vsel %vm683_vm3, %v2836_v55, 0.0 }
 0x520   :  { %2839 = vpow2.f32 %v720_v63  ;;  %v722_v4 = vmul.f32 1.442695, %v711_v2 }
 0x522   :  { %2841 = vpow2.f32 %v722_v4 }
 0x523   :  { %v704_v40 = vpop.xlane.xlu0 %703 }
 0x524   :  { %v714_v8 = vsub.f32 %v3306_v51, %v704_v40  ;;  %v2801_v51 = vld [vmem:[%s3753_s4 + $0x10] sm:$0xff]  }
 0x525   :  { %v707_v9 = vpop.xlane.xlu1 %706 }
 0x526   :  { %v728_v10 = vmul.f32 1.442695, %v714_v8  ;;  %v715_v11 = vsub.f32 %v3309_v28, %v707_v9  ;;  %v2803_v28 = vld [vmem:[%s3753_s4 + $0x20] sm:$0xff]  }
 0x527   :  { %v814_v12 = vpop.permute.xlu0 %813 }
 0x528   :  { %2843 = vpow2.f32 %v728_v10  ;;  %v730_v13 = vmul.f32 1.442695, %v715_v11  ;;  %2617 = vmatpush3.bf16.msra.mxu1 %v814_v12 }
 0x529   :  { %2628 = vmatprep.subr.bf16.mxu1 %v2969_v16  ;;  %v910_v24 = vpop.permute.xlu1 %909 }
 0x52a   :  { %v2840_v15 = vpop.eup %2839  ;;  %2845 = vpow2.f32 %v730_v13 }
 0x52b   :  { %v738_v17 = vsel %vm683_vm3, %v2840_v15, 0.0 }
 0x52c   :  { %v2842_v19 = vpop.eup %2841  ;;  %739 = vadd.xlane.f32.xlu0 %v738_v17 }
 0x52d   :  { %v741_v20 = vsel %vm683_vm3, %v2842_v19, 0.0  ;;  %v757_v23 = vpack.c.bf16 %v2842_v19, %v2840_v15 }
 0x52e   :  { %742 = vadd.xlane.f32.xlu1 %v741_v20 }
 0x52f   :  { %2619 = vmatmul.mubr.msk.bf16.vlgmr.msra.gmra.mrb[20].mxu1 %vm683_vm3, %v757_v23 }
 0x530   :  { %2629 = vmatpush3.bf16.msra.mxu1 %v910_v24  ;;  %745 = vadd.xlane.f32.xlu0 %v744_v25 }
 0x531   :  { %2630 = vmatprep.mubr.msk.bf16.mxu1 %vm2970_vm1, %v2969_v16  ;;  %2642 = vmatprep.subr.bf16.mxu1 %v2969_v16 }
 0x532   :  { %v2844_v27 = vpop.eup %2843  ;;  %748 = vadd.xlane.f32.xlu1 %v747_v26 }
 0x533   :  { %v750_v47 = vsel %vm683_vm3, %v2844_v27, 0.0 }
 0x534   :  { %v2846_v46 = vpop.eup %2845  ;;  %751 = vadd.xlane.f32.xlu0 %v750_v47 }
 0x535   :  { %v753_v52 = vsel %vm683_vm3, %v2846_v46, 0.0  ;;  %v759_v56 = vpack.c.bf16 %v2846_v46, %v2844_v27 }
 0x536   :  { %754 = vadd.xlane.f32.xlu1 %v753_v52 }
 0x537   :  { %2631 = vmatmul.mubr.msk.bf16.vlgmr.msra.gmra.mrb[24].mxu1 %vm683_vm3, %v759_v56 }
 0x538   :  { %2643 = vmatpush3.bf16.msra.mxu1 %v2801_v51  ;;  %2658 = vmatprep.mubr.msk.bf16.mxu1 %vm2970_vm1, %v2969_v16 }
 0x539   :  { %2644 = vmatprep.subr.bf16.mxu1 %v2969_v16 }
 0x53c   :  { %2645 = vmatpush3.bf16.msra.mxu1 %v2802_v57 }
 0x53d   :  { %2646 = vmatprep.subr.bf16.mxu1 %v2969_v16 }
 0x540   :  { %2647 = vmatpush3.bf16.msra.mxu1 %v2803_v28 }
 0x541   :  { %2648 = vmatprep.subr.bf16.mxu1 %v2969_v16 }
 0x544   :  { %2649 = vmatpush3.bf16.msra.mxu1 %v2804_v29 }
 0x545   :  { %2650 = vmatprep.subr.bf16.mxu1 %v2969_v16 }
 0x548   :  { %2651 = vmatpush3.bf16.msra.mxu1 %v2805_v30 }
 0x549   :  { %2652 = vmatprep.subr.bf16.mxu1 %v2969_v16 }
 0x54c   :  { %2653 = vmatpush3.bf16.msra.mxu1 %v2806_v31 }
 0x54d   :  { %2654 = vmatprep.subr.bf16.mxu1 %v2969_v16 }
 0x550   :  { %2655 = vmatpush3.bf16.msra.mxu1 %v2807_v32 }
 0x551   :  { %2656 = vmatprep.subr.bf16.mxu1 %v2969_v16 }
 0x554   :  { %2657 = vmatpush3.bf16.msra.mxu1 %v2808_v33 }
 0x555   :  { %2694 = vmatprep.subr.bf16.mxu1 %v2969_v16 }
 0x558   :  { %v737_v15 = vpop.xlane.xlu0 %736 }
 0x55a   :  { %v734_v17 = vpop.xlane.xlu1 %733 }
 0x57b   :  { %v805_v34 = vpop.f32.mrb[12].mxu0 }
 0x57c   :  { %v2614_v35 = vpop.f32.mrb[13].mxu0 }
 0x57d   :  { %v808_v36 = vpop.f32.mrb[14].mxu0 }
 0x57e   :  { %v2615_v37 = vpop.f32.mrb[15].mxu0 }
 0x585   :  { %v901_v38 = vpop.f32.mrb[16].mxu0 }
 0x586   :  { %v2626_v39 = vpop.f32.mrb[17].mxu0 }
 0x587   :  { %v3395_v41 = vpop.f32.mrb[18].mxu0 }
 0x588   :  { %v2627_v42 = vpop.f32.mrb[19].mxu0 }
 0x58d   :  { %v1040_v48 = vpop.f32.mrb[20].mxu0 }
 0x58e   :  { %v1041_v49 = vadd.f32 %v2385_v43, %v1040_v48  ;;  %v2640_v50 = vpop.f32.mrb[21].mxu0 }
 0x58f   :  { %v1043_v53 = vpop.f32.mrb[22].mxu0 }
 0x590   :  { %v1047_v22 = vmul.f32 %v1041_v49, %v1041_v49  ;;  %v1044_v55 = vadd.f32 %v2385_v43, %v1043_v53  ;;  %v2641_v59 = vpop.f32.mrb[23].mxu0 }
 0x592   :  { %v1049_v60 = vmul.f32 %v1047_v22, %v1041_v49  ;;  %v1048_v62 = vmul.f32 %v1044_v55, %v1044_v55 }
 0x594   :  { %v1051_v1 = vmul.f32 0.044715, %v1049_v60  ;;  %v1050_v58 = vmul.f32 %v1048_v62, %v1044_v55 }
 0x596   :  { %v1053_v61 = vadd.f32 %v1051_v1, %v1041_v49  ;;  %v1052_v0 = vmul.f32 0.044715, %v1050_v58 }
 0x598   :  { %v1055_v3 = vmul.f32 0.7978846, %v1053_v61  ;;  %v1054_v5 = vadd.f32 %v1052_v0, %v1044_v55 }
 0x59a   :  { %2847 = vtanh.f32 %v1055_v3  ;;  %v1056_v63 = vmul.f32 0.7978846, %v1054_v5 }
 0x59c   :  { %2849 = vtanh.f32 %v1056_v63 }
 0x59d   :  { %2851 = vrcp.f32 %v737_v15  ;;  %v2912_v15 = vld [vmem:[%s3749_s0 + $0x8] sm:$0xff] }
 0x59e   :  { %2853 = vrcp.f32 %v734_v17 }
 0x5a4   :  { %v2848_v2 = vpop.eup %2847 }
 0x5a5   :  { %v1059_v4 = vadd.f32 1.0, %v2848_v2  ;;  %v2389_v2 = vld [vmem:[#allocation4 + $0x3] ss:$0 sm:$0xff] }
 0x5a6   :  { %v2850_v40 = vpop.eup %2849 }
 0x5a7   :  { %v1061_v8 = vmul.f32 0.5, %v1059_v4  ;;  %v1060_v9 = vadd.f32 1.0, %v2850_v40  ;;  %v2852_v26 = vpop.eup %2851 }
 0x5a8   :  { %v2854_v27 = vpop.eup %2853  ;;  %v965_v28 = vmul.f32 %v2852_v26, %v808_v36 }
 0x5a9   :  { %v1062_v10 = vmul.f32 0.5, %v1060_v9  ;;  %v1063_v11 = vmul.f32 %v1061_v8, %v1041_v49  ;;  %v964_v52 = vmul.f32 %v2854_v27, %v805_v34  ;;  %v2911_v8 = vld [vmem:[%s3749_s0] sm:$0xff] }
 0x5aa   :  { %v979_v34 = vsel %vm68_vm0, %v965_v28, 0.0 }
 0x5ab   :  { %v1064_v12 = vmul.f32 %v1062_v10, %v1044_v55  ;;  %v972_v35 = vsel %vm68_vm0, %v964_v52, 0.0 }
 0x5ad   :  { %v1065_v13 = vpack.c.bf16 %v1064_v12, %v1063_v11 }
 0x5af   :  { %2659 = vmatmul.mubr.bf16.vlgmr.msra.gmra.mrb[28].mxu1 %v1065_v13 }
 0x5b0   :  { %2696 = vmatprep.mubr.msk.bf16.mxu1 %vm2970_vm1, %v2969_v16 }
 0x5b9   :  { %v740_v19 = vpop.xlane.xlu0 %739 }
 0x5bb   :  { %v743_v20 = vpop.xlane.xlu1 %742 }
 0x5bd   :  { %v746_v23 = vpop.xlane.xlu0 %745 }
 0x5be   :  { %2855 = vrcp.f32 %v746_v23 }
 0x5bf   :  { %v749_v24 = vpop.xlane.xlu1 %748  ;;  %2857 = vrcp.f32 %v740_v19 }
 0x5c0   :  { %2859 = vrcp.f32 %v749_v24 }
 0x5c1   :  { %2861 = vrcp.f32 %v743_v20  ;;  %v752_v25 = vpop.xlane.xlu0 %751 }
 0x5c2   :  { %2863 = vrcp.f32 %v752_v25 }
 0x5c3   :  { %v755_v47 = vpop.xlane.xlu1 %754 }
 0x5c4   :  { %2865 = vrcp.f32 %v755_v47 }
 0x5c8   :  { %v2856_v46 = vpop.eup %2855 }
 0x5c9   :  { %v2858_v51 = vpop.eup %2857  ;;  %v968_v31 = vmul.f32 %v2856_v46, %v901_v38 }
 0x5ca   :  { %v2860_v56 = vpop.eup %2859 }
 0x5cb   :  { %v2862_v32 = vpop.eup %2861  ;;  %v969_v43 = vmul.f32 %v2860_v56, %v3395_v41  ;;  %v975_v36 = vsel %vm68_vm0, %v968_v31, 0.0 }
 0x5cc   :  { %v2864_v22 = vpop.eup %2863 }
 0x5cd   :  { %v982_v38 = vsel %vm68_vm0, %v969_v43, 0.0  ;;  %v2398_v43 = vld [vmem:[#allocation4 + $0x4] ss:$0 sm:$0xff] }
 0x5ce   :  { %v2866_v1 = vpop.eup %2865 }
 0x602   :  { %v853_v57 = vpop.f32.mrb[20].mxu1 }
 0x603   :  { %v966_v29 = vmul.f32 %v2858_v51, %v853_v57  ;;  %v2620_v30 = vpop.f32.mrb[21].mxu1 }
 0x604   :  { %v856_v33 = vpop.f32.mrb[22].mxu1  ;;  %v2810_v30 = vld [vmem:[%s3752_s3 + $0x48] sm:$0xff]  }
 0x605   :  { %v973_v37 = vsel %vm68_vm0, %v966_v29, 0.0  ;;  %v967_v39 = vmul.f32 %v2862_v32, %v856_v33  ;;  %v2621_v42 = vpop.f32.mrb[23].mxu1  ;;  %v2809_v29 = vld [vmem:[%s3752_s3 + $0x40] sm:$0xff]  }
 0x606   :  { %v974_v48 = vadd.f32 %v973_v37, %v972_v35  ;;  %2663 = vmatpush3.bf16.msra.mxu0 %v2809_v29 }
 0x607   :  { %v980_v49 = vsel %vm68_vm0, %v967_v39, 0.0  ;;  %2664 = vmatprep.subr.bf16.mxu0 %v2969_v16 }
 0x608   :  { %v981_v50 = vadd.f32 %v980_v49, %v979_v34  ;;  %v976_v53 = vadd.f32 %v975_v36, %v974_v48 }
 0x60a   :  { %v949_v55 = vpop.f32.mrb[24].mxu1  ;;  %v983_v59 = vadd.f32 %v982_v38, %v981_v50  ;;  %2665 = vmatpush3.bf16.msra.mxu0 %v2810_v30  ;;  %v2399_v50 = vld [vmem:[#allocation4 + $0x5] ss:$0 sm:$0xff] }
 0x60b   :  { %v970_v60 = vmul.f32 %v2864_v22, %v949_v55  ;;  %v2632_v62 = vpop.f32.mrb[25].mxu1  ;;  %2670 = vmatprep.subr.bf16.mxu0 %v2969_v16  ;;  %v2811_v55 = vld [vmem:[%s3752_s3 + $0x50] sm:$0xff]  }
 0x60c   :  { %v952_v58 = vpop.f32.mrb[26].mxu1  ;;  %v2813_v62 = vld [vmem:[%s3752_s3 + $0x60] sm:$0xff]  }
 0x60d   :  { %v977_v41 = vsel %vm68_vm0, %v970_v60, 0.0  ;;  %v971_v61 = vmul.f32 %v2866_v1, %v952_v58  ;;  %v2633_v0 = vpop.f32.mrb[27].mxu1  ;;  %v2812_v60 = vld [vmem:[%s3752_s3 + $0x58] sm:$0xff]   ;;  %v2814_v1 = vld [vmem:[%s3752_s3 + $0x68] sm:$0xff]   ;;  %v2815_v58 = vld [vmem:[%s3752_s3 + $0x70] sm:$0xff]  }
 0x60e   :  { %v978_v3 = vadd.f32 %v977_v41, %v976_v53  ;;  %v2816_v41 = vld [vmem:[%s3752_s3 + $0x78] sm:$0xff]  }
 0x60f   :  { %v984_v5 = vsel %vm68_vm0, %v971_v61, 0.0 }
 0x610   :  { %v985_v63 = vadd.f32 %v984_v5, %v983_v59  ;;  %v1175_v9 = vadd.f32 %v2911_v8, %v978_v3 }
 0x612   :  { %v1176_v17 = vadd.f32 %v2912_v15, %v985_v63 }
 0x682   :  { %v1168_v4 = vpop.f32.mrb[28].mxu1 }
 0x683   :  { %v1169_v40 = vadd.f32 %v2389_v2, %v1168_v4  ;;  %v2660_v10 = vpop.f32.mrb[29].mxu1 }
 0x684   :  { %v1171_v11 = vpop.f32.mrb[30].mxu1 }
 0x685   :  { %v3411_v12 = vadd.f32 %v1175_v9, %v1169_v40  ;;  %v1172_v13 = vadd.f32 %v2389_v2, %v1171_v11  ;;  %v2661_v19 = vpop.f32.mrb[31].mxu1 }
 0x687   :  { %v3416_v20 = vadd.f32 %v1176_v17, %v1172_v13  ;;  %v1184_v23 = vsel %vm68_vm0, %v3411_v12, 0.0 }
 0x688   :  { %1185 = vadd.xlane.f32.xlu0 %v1184_v23 }
 0x689   :  { %v1187_v24 = vsel %vm68_vm0, %v3416_v20, 0.0 }
 0x68a   :  { %1188 = vadd.xlane.f32.xlu1 %v1187_v24 }
 0x715   :  { %v1186_v25 = vpop.xlane.xlu0 %1185 }
 0x716   :  { %v1190_v26 = vmul.f32 0.03125, %v1186_v25 }
 0x717   :  { %v1189_v27 = vpop.xlane.xlu1 %1188 }
 0x718   :  { %v1192_v47 = vsub.f32 %v3411_v12, %v1190_v26  ;;  %v1191_v46 = vmul.f32 0.03125, %v1189_v27 }
 0x71a   :  { %v1193_v51 = vsub.f32 %v3416_v20, %v1191_v46  ;;  %v1194_v52 = vmul.f32 %v1192_v47, %v1192_v47 }
 0x71c   :  { %v1196_v56 = vsel %vm68_vm0, %v1194_v52, 0.0  ;;  %v1195_v57 = vmul.f32 %v1193_v51, %v1193_v51 }
 0x71d   :  { %1197 = vadd.xlane.f32.xlu0 %v1196_v56 }
 0x71e   :  { %v1199_v28 = vsel %vm68_vm0, %v1195_v57, 0.0 }
 0x71f   :  { %1200 = vadd.xlane.f32.xlu1 %v1199_v28 }
 0x7aa   :  { %v1198_v31 = vpop.xlane.xlu0 %1197 }
 0x7ab   :  { %v1202_v32 = vmul.f32 0.03125, %v1198_v31 }
 0x7ac   :  { %v1201_v33 = vpop.xlane.xlu1 %1200 }
 0x7ad   :  { %v1204_v35 = vadd.f32 1e-05, %v1202_v32  ;;  %v1203_v37 = vmul.f32 0.03125, %v1201_v33 }
 0x7af   :  { %2867 = vrsqrt.f32 %v1204_v35  ;;  %v1205_v39 = vadd.f32 1e-05, %v1203_v37 }
 0x7b1   :  { %2869 = vrsqrt.f32 %v1205_v39 }
 0x7b9   :  { %v2868_v42 = vpop.eup %2867 }
 0x7ba   :  { %v1208_v48 = vmul.f32 %v2868_v42, %v1192_v47 }
 0x7bb   :  { %v2870_v34 = vpop.eup %2869 }
 0x7bc   :  { %v1214_v49 = vmul.f32 %v2398_v43, %v1208_v48  ;;  %v1209_v36 = vmul.f32 %v2870_v34, %v1193_v51 }
 0x7be   :  { %v1215_v53 = vmul.f32 %v2398_v43, %v1209_v36  ;;  %v1220_v38 = vadd.f32 %v2399_v50, %v1214_v49 }
 0x7c0   :  { %v1221_v22 = vadd.f32 %v2399_v50, %v1215_v53 }
 0x7c2   :  { %v3437_v59 = vpack.c.bf16 %v1221_v22, %v1220_v38 }
 0x7c4   :  { %2667 = vmatmul.mubr.msk.bf16.vlgmr.msra.gmra.mrb[24].mxu0 %vm68_vm0, %v3437_v59 }
 0x7c5   :  { %2671 = vmatpush3.bf16.msra.mxu0 %v2811_v55  ;;  %2674 = vmatprep.mubr.msk.bf16.mxu0 %vm2970_vm1, %v2969_v16 }
 0x7c6   :  { %2672 = vmatprep.subr.bf16.mxu0 %v2969_v16 }
 0x7c9   :  { %2673 = vmatpush3.bf16.msra.mxu0 %v2812_v60 }
 0x7ca   :  { %2678 = vmatprep.subr.bf16.mxu0 %v2969_v16 }
 0x7cc   :  { %2675 = vmatmul.mubr.msk.bf16.vlgmr.msra.gmra.mrb[28].mxu0 %vm68_vm0, %v3437_v59 }
 0x7cd   :  { %2679 = vmatpush3.bf16.msra.mxu0 %v2813_v62  ;;  %2682 = vmatprep.mubr.msk.bf16.mxu0 %vm2970_vm1, %v2969_v16 }
 0x7ce   :  { %2680 = vmatprep.subr.bf16.mxu0 %v2969_v16 }
 0x7d1   :  { %2681 = vmatpush3.bf16.msra.mxu0 %v2814_v1  ;;  %v2913_v1 = vld [vmem:[%s3751_s2] sm:$0xff] }
 0x7d2   :  { %2686 = vmatprep.subr.bf16.mxu0 %v2969_v16 }
 0x7d4   :  { %2683 = vmatmul.mubr.msk.bf16.vlgmr.msra.gmra.mrb[32].mxu0 %vm68_vm0, %v3437_v59 }
 0x7d5   :  { %2687 = vmatpush3.bf16.msra.mxu0 %v2815_v58  ;;  %2690 = vmatprep.mubr.msk.bf16.mxu0 %vm2970_vm1, %v2969_v16 }
 0x7d6   :  { %2688 = vmatprep.subr.bf16.mxu0 %v2969_v16 }
 0x7d9   :  { %2689 = vmatpush3.bf16.msra.mxu0 %v2816_v41 }
 0x7da   :  { %2700 = vmatprep.subr.bf16.mxu0 %v2969_v16 }
 0x7dc   :  { %2691 = vmatmul.mubr.msk.bf16.vlgmr.msra.gmra.mrb[36].mxu0 %vm68_vm0, %v3437_v59 }
 0x7dd   :  { %2702 = vmatprep.mubr.msk.bf16.mxu0 %vm2970_vm1, %v2969_v16 }
 0x897   :  { %v3476_v61 = vpop.f32.mrb[24].mxu0 }
 0x898   :  { %v2668_v0 = vpop.f32.mrb[25].mxu0  ;;  %v1519_v3 = vmul.f32 %v3476_v61, %v3131_v44  ;;  %v1463_v47 = vmul.f32 %v3476_v61, %v3183_v14  ;;  %v1511_v57 = vmul.f32 %v3476_v61, %v3175_v6  ;;  %v1455_v58 = vmul.f32 %v2913_v1, %v3476_v61 }
 0x899   :  { %v3480_v5 = vpop.f32.mrb[26].mxu0 }
 0x89a   :  { %1535 = vrot.lane.b32.xlu0 %v1519_v3, %s2973_s10  ;;  %v2669_v63 = vpop.f32.mrb[27].mxu0  ;;  %v1520_v2 = vmul.f32 %v3480_v5, %v3133_v45  ;;  %v1851_v4 = vpack.c.bf16 %v3480_v5, %v3476_v61  ;;  %v1512_v28 = vmul.f32 %v3480_v5, %v3177_v7  ;;  %v1464_v33 = vmul.f32 %v3480_v5, %v3187_v18 }
 0x89c   :  { %1537 = vrot.lane.b32.xlu1 %v1520_v2, %s2973_s10 }
 0x89f   :  { %v3488_v40 = vpop.f32.mrb[28].mxu0 }
 0x8a0   :  { %v2676_v8 = vpop.f32.mrb[29].mxu0  ;;  %v1521_v39 = vmul.f32 %v3488_v40, %v3131_v44 }
 0x8a1   :  { %v3490_v9 = vpop.f32.mrb[30].mxu0 }
 0x8a2   :  { %v2677_v10 = vpop.f32.mrb[31].mxu0  ;;  %v1852_v11 = vpack.c.bf16 %v3490_v9, %v3488_v40  ;;  %v1522_v38 = vmul.f32 %v3490_v9, %v3133_v45 }
 0x8a7   :  { %v3494_v13 = vpop.f32.mrb[32].mxu0 }
 0x8a8   :  { %v2684_v15 = vpop.f32.mrb[33].mxu0  ;;  %v1523_v17 = vmul.f32 %v3494_v13, %v3131_v44  ;;  %v1467_v35 = vmul.f32 %v3494_v13, %v3183_v14  ;;  %v1515_v42 = vmul.f32 %v3494_v13, %v3175_v6 }
 0x8a9   :  { %v3498_v19 = vpop.f32.mrb[34].mxu0 }
 0x8aa   :  { %1543 = vrot.lane.b32.xlu1 %v1523_v17, %s2973_s10  ;;  %v2685_v23 = vpop.f32.mrb[35].mxu0  ;;  %v1853_v24 = vpack.c.bf16 %v3498_v19, %v3494_v13  ;;  %v1524_v25 = vmul.f32 %v3498_v19, %v3133_v45  ;;  %v1516_v43 = vmul.f32 %v3498_v19, %v3177_v7  ;;  %v1468_v53 = vmul.f32 %v3498_v19, %v3187_v18 }
 0x8ab   :  { %v1459_v17 = vmul.f32 %v2913_v1, %v3494_v13 }
 0x8ae   :  { %1545 = vrot.lane.b32.xlu1 %v1524_v25, %s2973_s10 }
 0x8af   :  { %v3506_v26 = vpop.f32.mrb[36].mxu0 }
 0x8b0   :  { %v2692_v27 = vpop.f32.mrb[37].mxu0  ;;  %v1525_v36 = vmul.f32 %v3506_v26, %v3131_v44  ;;  %v1465_v44 = vmul.f32 %v3488_v40, %v3183_v14 }
 0x8b1   :  { %v3510_v46 = vpop.f32.mrb[38].mxu0 }
 0x8b2   :  { %1479 = vrot.lane.b32.xlu1 %v1463_v47, %s2973_s10  ;;  %v2693_v51 = vpop.f32.mrb[39].mxu0  ;;  %v1854_v52 = vpack.c.bf16 %v3510_v46, %v3506_v26  ;;  %v1526_v22 = vmul.f32 %v3510_v46, %v3133_v45  ;;  %v2914_v45 = vld [vmem:[%s3751_s2 + $0x8] sm:$0xff] }
 0x8b3   :  { %v1456_v41 = vmul.f32 %v2914_v45, %v3480_v5  ;;  %v1460_v23 = vmul.f32 %v2914_v45, %v3498_v19 }
 0x90c   :  { %v1536_v56 = vpop.permute.xlu0 %1535 }
 0x90d   :  { %v1559_v30 = vadd.f32 %v1536_v56, %v1511_v57  ;;  %v1513_v56 = vmul.f32 %v3488_v40, %v3175_v6 }
 0x90e   :  { %v1538_v29 = vpop.permute.xlu1 %1537 }
 0x90f   :  { %v1560_v31 = vadd.f32 %v1538_v29, %v1512_v28  ;;  %v1514_v28 = vmul.f32 %v3490_v9, %v3177_v7 }
 0x911   :  { %v1571_v32 = vpack.c.bf16 %v1560_v31, %v1559_v30 }
 0x913   :  { %1576 = vrot.lane.b32.xlu0 %v1571_v32, %s2974_s12 }
 0x917   :  { %1481 = vrot.lane.b32.xlu0 %v1464_v33, %s2973_s10  ;;  %v1517_v33 = vmul.f32 %v3506_v26, %v3175_v6  ;;  %v1469_v6 = vmul.f32 %v3506_v26, %v3183_v14 }
 0x91b   :  { %1487 = vrot.lane.b32.xlu0 %v1467_v35, %s2973_s10 }
 0x91c   :  { %v1544_v37 = vpop.permute.xlu1 %1543 }
 0x91d   :  { %v1563_v34 = vadd.f32 %v1544_v37, %v1515_v42  ;;  %v1518_v37 = vmul.f32 %v3510_v46, %v3177_v7 }
 0x91f   :  { %1539 = vrot.lane.b32.xlu0 %v1521_v39, %s2973_s10 }
 0x920   :  { %v1546_v48 = vpop.permute.xlu1 %1545 }
 0x921   :  { %v1564_v49 = vadd.f32 %v1546_v48, %v1516_v43 }
 0x923   :  { %v1573_v50 = vpack.c.bf16 %v1564_v49, %v1563_v34  ;;  %1547 = vrot.lane.b32.xlu0 %v1525_v36, %s2973_s10  ;;  %v1466_v34 = vmul.f32 %v3490_v9, %v3187_v18  ;;  %v1470_v49 = vmul.f32 %v3510_v46, %v3187_v18 }
 0x924   :  { %v1480_v62 = vpop.permute.xlu1 %1479 }
 0x925   :  { %1676 = vrot.lane.b32.xlu1 %v1573_v50, %s2974_s12  ;;  %v1503_v3 = vadd.f32 %v1480_v62, %v1455_v58  ;;  %v1462_v62 = vmul.f32 %v2914_v45, %v3510_v46 }
 0x929   :  { %1489 = vrot.lane.b32.xlu1 %v1468_v53, %s2973_s10  ;;  %v1457_v53 = vmul.f32 %v2913_v1, %v3488_v40 }
 0x92d   :  { %1541 = vrot.lane.b32.xlu1 %v1522_v38, %s2973_s10  ;;  %v1458_v38 = vmul.f32 %v2914_v45, %v3490_v9 }
 0x931   :  { %1549 = vrot.lane.b32.xlu1 %v1526_v22, %s2973_s10 }
 0x935   :  { %1483 = vrot.lane.b32.xlu1 %v1465_v44, %s2973_s10 }
 0x985   :  { %v1577_v55 = vpop.permute.xlu0 %1576 }
 0x986   :  { %v1582_v60 = vsel %vm485_vm2, %v1577_v55, 0 }
 0x987   :  { %2695 = vmatpush3.bf16.xpose.msra.mxu1 %v1582_v60  ;;  %v1461_v60 = vmul.f32 %v2913_v1, %v3506_v26  ;;  %v2818_v26 = vld [vmem:[%s3753_s4 + $0x58] sm:$0xff]  }
 0x988   :  { %2706 = vmatprep.subr.bf16.mxu1 %v2969_v16 }
 0x989   :  { %v1482_v0 = vpop.permute.xlu0 %1481 }
 0x98a   :  { %v1504_v63 = vadd.f32 %v1482_v0, %v1456_v41 }
 0x98c   :  { %v1567_v2 = vpack.c.bf16 %v1504_v63, %v1503_v3 }
 0x98d   :  { %v1488_v8 = vpop.permute.xlu0 %1487 }
 0x98e   :  { %2697 = vmatmul.mubr.msk.bf16.vlgmr.msra.gmra.mrb[32].mxu1 %vm485_vm2, %v1567_v2  ;;  %v1507_v47 = vadd.f32 %v1488_v8, %v1459_v17 }
 0x98f   :  { %2708 = vmatprep.mubr.msk.bf16.mxu1 %vm2970_vm1, %v2969_v16 }
 0x991   :  { %v1540_v25 = vpop.permute.xlu0 %1539 }
 0x992   :  { %v1561_v30 = vadd.f32 %v1540_v25, %v1513_v56 }
 0x995   :  { %v1548_v32 = vpop.permute.xlu0 %1547 }
 0x996   :  { %v1565_v42 = vadd.f32 %v1548_v32, %v1517_v33 }
 0x997   :  { %v1677_v10 = vpop.permute.xlu1 %1676 }
 0x998   :  { %v1682_v15 = vsel %vm485_vm2, %v1677_v10, 0 }
 0x999   :  { %2707 = vmatpush3.bf16.xpose.msra.mxu1 %v1682_v15 }
 0x99a   :  { %2718 = vmatprep.subr.bf16.mxu1 %v2969_v16 }
 0x99b   :  { %v1490_v27 = vpop.permute.xlu1 %1489 }
 0x99c   :  { %v1508_v51 = vadd.f32 %v1490_v27, %v1460_v23 }
 0x99e   :  { %v1569_v57 = vpack.c.bf16 %v1508_v51, %v1507_v47 }
 0x99f   :  { %v1542_v29 = vpop.permute.xlu1 %1541 }
 0x9a0   :  { %v1562_v31 = vadd.f32 %v1542_v29, %v1514_v28  ;;  %2709 = vmatmul.mubr.msk.bf16.vlgmr.msra.gmra.mrb[36].mxu1 %vm485_vm2, %v1569_v57 }
 0x9a1   :  { %2720 = vmatprep.mubr.msk.bf16.mxu1 %vm2970_vm1, %v2969_v16 }
 0x9a2   :  { %v1572_v35 = vpack.c.bf16 %v1562_v31, %v1561_v30 }
 0x9a3   :  { %v1550_v39 = vpop.permute.xlu1 %1549 }
 0x9a4   :  { %v1566_v43 = vadd.f32 %v1550_v39, %v1518_v37  ;;  %1626 = vrot.lane.b32.xlu0 %v1572_v35, %s2974_s12 }
 0x9a6   :  { %v1574_v48 = vpack.c.bf16 %v1566_v43, %v1565_v42 }
 0x9a7   :  { %v1484_v7 = vpop.permute.xlu1 %1483 }
 0x9a8   :  { %1485 = vrot.lane.b32.xlu0 %v1466_v34, %s2973_s10  ;;  %1726 = vrot.lane.b32.xlu1 %v1574_v48, %s2974_s12  ;;  %v1505_v44 = vadd.f32 %v1484_v7, %v1457_v53 }
 0x9ac   :  { %1491 = vrot.lane.b32.xlu0 %v1469_v6, %s2973_s10  ;;  %1493 = vrot.lane.b32.xlu1 %v1470_v49, %s2973_s10 }
 0xa16   :  { %v1627_v36 = vpop.permute.xlu0 %1626 }
 0xa17   :  { %v1632_v50 = vsel %vm485_vm2, %v1627_v36, 0 }
 0xa18   :  { %2701 = vmatpush3.bf16.xpose.msra.mxu0 %v1632_v50 }
 0xa19   :  { %2712 = vmatprep.subr.bf16.mxu0 %v2969_v16 }
 0xa1a   :  { %v1486_v22 = vpop.permute.xlu0 %1485  ;;  %v1727_v14 = vpop.permute.xlu1 %1726 }
 0xa1b   :  { %v1506_v55 = vadd.f32 %v1486_v22, %v1458_v38  ;;  %v1732_v0 = vsel %vm485_vm2, %v1727_v14, 0 }
 0xa1d   :  { %v1568_v18 = vpack.c.bf16 %v1506_v55, %v1505_v44 }
 0xa1e   :  { %v1492_v58 = vpop.permute.xlu0 %1491  ;;  %v1494_v41 = vpop.permute.xlu1 %1493 }
 0xa1f   :  { %v1509_v3 = vadd.f32 %v1492_v58, %v1461_v60  ;;  %v1510_v63 = vadd.f32 %v1494_v41, %v1462_v62  ;;  %2703 = vmatmul.mubr.msk.bf16.vlgmr.msra.gmra.mrb[40].mxu0 %vm485_vm2, %v1568_v18 }
 0xa20   :  { %2713 = vmatpush3.bf16.xpose.msra.mxu0 %v1732_v0  ;;  %2714 = vmatprep.mubr.msk.bf16.mxu0 %vm2970_vm1, %v2969_v16 }
 0xa21   :  { %v1570_v2 = vpack.c.bf16 %v1510_v63, %v1509_v3  ;;  %2724 = vmatprep.subr.bf16.mxu0 %v2969_v16  ;;  %v2817_v3 = vld [vmem:[%s3753_s4 + $0x50] sm:$0xff]  }
 0xa27   :  { %2715 = vmatmul.mubr.msk.bf16.vlgmr.msra.gmra.mrb[44].mxu0 %vm485_vm2, %v1570_v2 }
 0xa28   :  { %2726 = vmatprep.mubr.msk.bf16.mxu0 %vm2970_vm1, %v2969_v16 }
 0xa61   :  { %v1618_v1 = vpop.f32.mrb[32].mxu1 }
 0xa62   :  { %v1619_v45 = vadd.f32 %v1618_v1, %v3275_v21  ;;  %v2698_v8 = vpop.f32.mrb[33].mxu1 }
 0xa63   :  { %v1621_v10 = vpop.f32.mrb[34].mxu1 }
 0xa64   :  { %v1622_v15 = vadd.f32 %v1621_v10, %v3277_v54  ;;  %v2699_v17 = vpop.f32.mrb[35].mxu1  ;;  %v1775_v23 = vsel %vm683_vm3, %v1619_v45, -inf }
 0xa65   :  { %1776 = vmax.xlane.f32.xlu0 %v1775_v23 }
 0xa66   :  { %v1778_v25 = vsel %vm683_vm3, %v1622_v15, -inf }
 0xa67   :  { %1779 = vmax.xlane.f32.xlu1 %v1778_v25 }
 0xa73   :  { %v1718_v27 = vpop.f32.mrb[36].mxu1 }
 0xa74   :  { %v1719_v47 = vadd.f32 %v1718_v27, %v3275_v21  ;;  %v2710_v51 = vpop.f32.mrb[37].mxu1 }
 0xa75   :  { %v1721_v56 = vpop.f32.mrb[38].mxu1 }
 0xa76   :  { %v1722_v57 = vadd.f32 %v1721_v56, %v3277_v54  ;;  %v2711_v28 = vpop.f32.mrb[39].mxu1  ;;  %v1787_v29 = vsel %vm683_vm3, %v1719_v47, -inf }
 0xa77   :  { %1788 = vmax.xlane.f32.xlu0 %v1787_v29 }
 0xa78   :  { %1952 = vrot.lane.b32.xlu1 %v1853_v24, %s2975_s11  ;;  %v1790_v30 = vsel %vm683_vm3, %v1722_v57, -inf }
 0xa7b   :  { %1791 = vmax.xlane.f32.xlu0 %v1790_v30 }
 0xa91   :  { %1856 = vrot.lane.b32.xlu0 %v1851_v4, %s2975_s11 }
 0xaf2   :  { %v1668_v31 = vpop.f32.mrb[40].mxu0  ;;  %v1777_v61 = vpop.xlane.xlu0 %1776 }
 0xaf3   :  { %v3619_v32 = vadd.f32 %v1668_v31, %v3275_v21  ;;  %v2704_v33 = vpop.f32.mrb[41].mxu0  ;;  %v1799_v42 = vsub.f32 %v1619_v45, %v1777_v61  ;;  %v2823_v61 = vld [vmem:[%s3753_s4 + $0x80] sm:$0xff]  }
 0xaf4   :  { %v1671_v35 = vpop.f32.mrb[42].mxu0  ;;  %v1780_v19 = vpop.xlane.xlu1 %1779 }
 0xaf5   :  { %v3622_v37 = vadd.f32 %v1671_v35, %v3277_v54  ;;  %v2705_v39 = vpop.f32.mrb[43].mxu0  ;;  %v1781_v13 = vsel %vm683_vm3, %v3619_v32, -inf  ;;  %v1800_v5 = vsub.f32 %v1622_v15, %v1780_v19  ;;  %v1807_v50 = vmul.f32 1.442695, %v1799_v42  ;;  %v2819_v35 = vld [vmem:[%s3753_s4 + $0x60] sm:$0xff]   ;;  %v2821_v19 = vld [vmem:[%s3753_s4 + $0x70] sm:$0xff]  }
 0xaf6   :  { %1782 = vmax.xlane.f32.xlu1 %v1781_v13  ;;  %v2820_v13 = vld [vmem:[%s3753_s4 + $0x68] sm:$0xff]   ;;  %v2826_v42 = vld [vmem:[%s3753_s4 + $0x98] sm:$0xff]  }
 0xaf7   :  { %v1784_v24 = vsel %vm683_vm3, %v3622_v37, -inf  ;;  %v1809_v6 = vmul.f32 1.442695, %v1800_v5  ;;  %v2824_v5 = vld [vmem:[%s3753_s4 + $0x88] sm:$0xff]  }
 0xaf8   :  { %1785 = vmax.xlane.f32.xlu0 %v1784_v24  ;;  %v1953_v58 = vpop.permute.xlu1 %1952  ;;  %v2822_v24 = vld [vmem:[%s3753_s4 + $0x78] sm:$0xff]  }
 0xaf9   :  { %2871 = vpow2.f32 %v1809_v6 }
 0xafa   :  { %v1768_v4 = vpop.f32.mrb[44].mxu0  ;;  %2873 = vpow2.f32 %v1807_v50 }
 0xafb   :  { %v1769_v43 = vadd.f32 %v1768_v4, %v3275_v21  ;;  %v2716_v48 = vpop.f32.mrb[45].mxu0  ;;  %v2825_v4 = vld [vmem:[%s3753_s4 + $0x90] sm:$0xff]  }
 0xafc   :  { %v1771_v34 = vpop.f32.mrb[46].mxu0 }
 0xafd   :  { %v1772_v49 = vadd.f32 %v1771_v34, %v3277_v54  ;;  %v2717_v7 = vpop.f32.mrb[47].mxu0  ;;  %v1793_v36 = vsel %vm683_vm3, %v1769_v43, -inf }
 0xafe   :  { %1794 = vmax.xlane.f32.xlu0 %v1793_v36 }
 0xaff   :  { %v1796_v53 = vsel %vm683_vm3, %v1772_v49, -inf }
 0xb00   :  { %1797 = vmax.xlane.f32.xlu1 %v1796_v53  ;;  %v2440_v53 = vld [vmem:[#allocation4 + $0x6] ss:$0 sm:$0xff] }
 0xb03   :  { %v2872_v55 = vpop.eup %2871 }
 0xb04   :  { %v1789_v38 = vpop.xlane.xlu0 %1788  ;;  %v2874_v54 = vpop.eup %2873  ;;  %v1826_v40 = vsel %vm683_vm3, %v2872_v55, 0.0 }
 0xb05   :  { %v1803_v22 = vsub.f32 %v1719_v47, %v1789_v38  ;;  %v1847_v62 = vpack.c.bf16 %v2872_v55, %v2874_v54  ;;  %v1823_v9 = vsel %vm683_vm3, %v2874_v54, 0.0 }
 0xb07   :  { %v1815_v14 = vmul.f32 1.442695, %v1803_v22 }
 0xb08   :  { %v1792_v44 = vpop.xlane.xlu0 %1791 }
 0xb09   :  { %v1804_v21 = vsub.f32 %v1722_v57, %v1792_v44  ;;  %2875 = vpow2.f32 %v1815_v14 }
 0xb0b   :  { %v1817_v18 = vmul.f32 1.442695, %v1804_v21 }
 0xb0c   :  { %v1857_v60 = vpop.permute.xlu0 %1856 }
 0xb0d   :  { %2877 = vpow2.f32 %v1817_v18  ;;  %2719 = vmatpush3.bf16.msra.mxu1 %v1857_v60 }
 0xb0e   :  { %2730 = vmatprep.subr.bf16.mxu1 %v2969_v16 }
 0xb10   :  { %2721 = vmatmul.mubr.msk.bf16.vlgmr.msra.gmra.mrb[40].mxu1 %vm683_vm3, %v1847_v62 }
 0xb11   :  { %2731 = vmatpush3.bf16.msra.mxu1 %v1953_v58  ;;  %2000 = vrot.lane.b32.xlu1 %v1854_v52, %s2975_s11 }
 0xb12   :  { %2732 = vmatprep.mubr.msk.bf16.mxu1 %vm2970_vm1, %v2969_v16  ;;  %2742 = vmatprep.subr.bf16.mxu1 %v2969_v16 }
 0xb13   :  { %v2876_v41 = vpop.eup %2875 }
 0xb14   :  { %1904 = vrot.lane.b32.xlu0 %v1852_v11, %s2975_s11  ;;  %v1835_v29 = vsel %vm683_vm3, %v2876_v41, 0.0 }
 0xb17   :  { %v2878_v0 = vpop.eup %2877 }
 0xb18   :  { %v1849_v63 = vpack.c.bf16 %v2878_v0, %v2876_v41  ;;  %v1838_v30 = vsel %vm683_vm3, %v2878_v0, 0.0 }
 0xb1a   :  { %2733 = vmatmul.mubr.msk.bf16.vlgmr.msra.gmra.mrb[44].mxu1 %vm683_vm3, %v1849_v63 }
 0xb1b   :  { %2743 = vmatpush3.bf16.msra.mxu1 %v2817_v3  ;;  %2746 = vmatprep.mubr.msk.bf16.mxu1 %vm2970_vm1, %v2969_v16 }
 0xb1c   :  { %2744 = vmatprep.subr.bf16.mxu1 %v2969_v16 }
 0xb1f   :  { %2745 = vmatpush3.bf16.msra.mxu1 %v2818_v26 }
 0xb20   :  { %2770 = vmatprep.subr.bf16.mxu1 %v2969_v16 }
 0xb22   :  { %2747 = vmatmul.mubr.msk.bf16.vlgmr.msra.gmra.mrb[48].mxu1 %vm68_vm0, %v3437_v59 }
 0xb23   :  { %2774 = vmatprep.mubr.msk.bf16.mxu1 %vm2970_vm1, %v2969_v16 }
 0xb33   :  { %1827 = vadd.xlane.f32.xlu0 %v1826_v40 }
 0xb35   :  { %1824 = vadd.xlane.f32.xlu1 %v1823_v9 }
 0xb83   :  { %v1783_v11 = vpop.xlane.xlu1 %1782 }
 0xb84   :  { %v1801_v46 = vsub.f32 %v3619_v32, %v1783_v11 }
 0xb85   :  { %v1786_v52 = vpop.xlane.xlu0 %1785 }
 0xb86   :  { %v1811_v2 = vmul.f32 1.442695, %v1801_v46  ;;  %v1802_v1 = vsub.f32 %v3622_v37, %v1786_v52 }
 0xb88   :  { %2879 = vpow2.f32 %v1811_v2  ;;  %v1813_v45 = vmul.f32 1.442695, %v1802_v1 }
 0xb8a   :  { %2881 = vpow2.f32 %v1813_v45 }
 0xb8b   :  { %v1795_v59 = vpop.xlane.xlu0 %1794 }
 0xb8c   :  { %v1805_v8 = vsub.f32 %v1769_v43, %v1795_v59 }
 0xb8d   :  { %v1798_v10 = vpop.xlane.xlu1 %1797 }
 0xb8e   :  { %v1819_v15 = vmul.f32 1.442695, %v1805_v8  ;;  %v1806_v17 = vsub.f32 %v1772_v49, %v1798_v10 }
 0xb8f   :  { %v1905_v23 = vpop.permute.xlu0 %1904 }
 0xb90   :  { %2883 = vpow2.f32 %v1819_v15  ;;  %v1821_v25 = vmul.f32 1.442695, %v1806_v17  ;;  %2725 = vmatpush3.bf16.msra.mxu0 %v1905_v23 }
 0xb91   :  { %2736 = vmatprep.subr.bf16.mxu0 %v2969_v16  ;;  %v2001_v28 = vpop.permute.xlu1 %2000 }
 0xb92   :  { %v2880_v27 = vpop.eup %2879  ;;  %2885 = vpow2.f32 %v1821_v25 }
 0xb93   :  { %v1829_v47 = vsel %vm683_vm3, %v2880_v27, 0.0 }
 0xb94   :  { %v2882_v51 = vpop.eup %2881  ;;  %1830 = vadd.xlane.f32.xlu0 %v1829_v47 }
 0xb95   :  { %v1832_v56 = vsel %vm683_vm3, %v2882_v51, 0.0  ;;  %v1848_v57 = vpack.c.bf16 %v2882_v51, %v2880_v27 }
 0xb96   :  { %1833 = vadd.xlane.f32.xlu1 %v1832_v56 }
 0xb97   :  { %2727 = vmatmul.mubr.msk.bf16.vlgmr.msra.gmra.mrb[48].mxu0 %vm683_vm3, %v1848_v57 }
 0xb98   :  { %2737 = vmatpush3.bf16.msra.mxu0 %v2001_v28  ;;  %1836 = vadd.xlane.f32.xlu0 %v1835_v29 }
 0xb99   :  { %2738 = vmatprep.mubr.msk.bf16.mxu0 %vm2970_vm1, %v2969_v16  ;;  %2750 = vmatprep.subr.bf16.mxu0 %v2969_v16 }
 0xb9a   :  { %v2884_v31 = vpop.eup %2883  ;;  %1839 = vadd.xlane.f32.xlu1 %v1838_v30 }
 0xb9b   :  { %v1841_v32 = vsel %vm683_vm3, %v2884_v31, 0.0 }
 0xb9c   :  { %v2886_v33 = vpop.eup %2885  ;;  %1842 = vadd.xlane.f32.xlu0 %v1841_v32 }
 0xb9d   :  { %v1844_v37 = vsel %vm683_vm3, %v2886_v33, 0.0  ;;  %v1850_v39 = vpack.c.bf16 %v2886_v33, %v2884_v31 }
 0xb9e   :  { %1845 = vadd.xlane.f32.xlu1 %v1844_v37 }
 0xb9f   :  { %2739 = vmatmul.mubr.msk.bf16.vlgmr.msra.gmra.mrb[52].mxu0 %vm683_vm3, %v1850_v39 }
 0xba0   :  { %2751 = vmatpush3.bf16.msra.mxu0 %v2819_v35  ;;  %2766 = vmatprep.mubr.msk.bf16.mxu0 %vm2970_vm1, %v2969_v16 }
 0xba1   :  { %2752 = vmatprep.subr.bf16.mxu0 %v2969_v16 }
 0xba4   :  { %2753 = vmatpush3.bf16.msra.mxu0 %v2820_v13 }
 0xba5   :  { %2754 = vmatprep.subr.bf16.mxu0 %v2969_v16 }
 0xba8   :  { %2755 = vmatpush3.bf16.msra.mxu0 %v2821_v19 }
 0xba9   :  { %2756 = vmatprep.subr.bf16.mxu0 %v2969_v16 }
 0xbac   :  { %2757 = vmatpush3.bf16.msra.mxu0 %v2822_v24 }
 0xbad   :  { %2758 = vmatprep.subr.bf16.mxu0 %v2969_v16 }
 0xbb0   :  { %2759 = vmatpush3.bf16.msra.mxu0 %v2823_v61 }
 0xbb1   :  { %2760 = vmatprep.subr.bf16.mxu0 %v2969_v16 }
 0xbb4   :  { %2761 = vmatpush3.bf16.msra.mxu0 %v2824_v5 }
 0xbb5   :  { %2762 = vmatprep.subr.bf16.mxu0 %v2969_v16 }
 0xbb8   :  { %2763 = vmatpush3.bf16.msra.mxu0 %v2825_v4 }
 0xbb9   :  { %2764 = vmatprep.subr.bf16.mxu0 %v2969_v16 }
 0xbbc   :  { %2765 = vmatpush3.bf16.msra.mxu0 %v2826_v42 }
 0xbc0   :  { %v1828_v8 = vpop.xlane.xlu0 %1827 }
 0xbc2   :  { %v1825_v10 = vpop.xlane.xlu1 %1824 }
 0xbe3   :  { %v1896_v43 = vpop.f32.mrb[40].mxu1 }
 0xbe4   :  { %v2722_v48 = vpop.f32.mrb[41].mxu1 }
 0xbe5   :  { %v1899_v34 = vpop.f32.mrb[42].mxu1 }
 0xbe6   :  { %v2723_v6 = vpop.f32.mrb[43].mxu1 }
 0xbed   :  { %v1992_v49 = vpop.f32.mrb[44].mxu1 }
 0xbee   :  { %v2734_v7 = vpop.f32.mrb[45].mxu1 }
 0xbef   :  { %v3709_v36 = vpop.f32.mrb[46].mxu1 }
 0xbf0   :  { %v2735_v50 = vpop.f32.mrb[47].mxu1 }
 0xbf5   :  { %v2132_v38 = vpop.f32.mrb[48].mxu1 }
 0xbf6   :  { %v2133_v22 = vadd.f32 %v2440_v53, %v2132_v38  ;;  %v2748_v14 = vpop.f32.mrb[49].mxu1 }
 0xbf7   :  { %v2135_v44 = vpop.f32.mrb[50].mxu1 }
 0xbf8   :  { %v2139_v21 = vmul.f32 %v2133_v22, %v2133_v22  ;;  %v2136_v55 = vadd.f32 %v2440_v53, %v2135_v44  ;;  %v2749_v18 = vpop.f32.mrb[51].mxu1 }
 0xbfa   :  { %v2141_v60 = vmul.f32 %v2139_v21, %v2133_v22  ;;  %v2140_v54 = vmul.f32 %v2136_v55, %v2136_v55 }
 0xbfc   :  { %v2143_v62 = vmul.f32 0.044715, %v2141_v60  ;;  %v2142_v58 = vmul.f32 %v2140_v54, %v2136_v55 }
 0xbfe   :  { %v2145_v41 = vadd.f32 %v2143_v62, %v2133_v22  ;;  %v2144_v0 = vmul.f32 0.044715, %v2142_v58  ;;  %v2460_v58 = vld [vmem:[#allocation4 + $0x7] ss:$0 sm:$0xff] }
 0xc00   :  { %v2147_v3 = vmul.f32 0.7978846, %v2145_v41  ;;  %v2146_v63 = vadd.f32 %v2144_v0, %v2136_v55 }
 0xc02   :  { %2887 = vtanh.f32 %v2147_v3  ;;  %v2148_v26 = vmul.f32 0.7978846, %v2146_v63 }
 0xc04   :  { %2889 = vtanh.f32 %v2148_v26 }
 0xc05   :  { %2891 = vrcp.f32 %v1828_v8 }
 0xc06   :  { %2893 = vrcp.f32 %v1825_v10 }
 0xc0c   :  { %v2888_v40 = vpop.eup %2887 }
 0xc0d   :  { %v2151_v9 = vadd.f32 1.0, %v2888_v40 }
 0xc0e   :  { %v2890_v11 = vpop.eup %2889 }
 0xc0f   :  { %v2153_v46 = vmul.f32 0.5, %v2151_v9  ;;  %v2152_v52 = vadd.f32 1.0, %v2890_v11  ;;  %v2892_v47 = vpop.eup %2891 }
 0xc10   :  { %v2894_v51 = vpop.eup %2893  ;;  %v2056_v32 = vmul.f32 %v2892_v47, %v1899_v34  ;;  %v2298_v47 = vld [vmem:[%s3755_s6 + $0x8] sm:$0xff] }
 0xc11   :  { %v2154_v2 = vmul.f32 0.5, %v2152_v52  ;;  %v2155_v1 = vmul.f32 %v2153_v46, %v2133_v22  ;;  %v2055_v29 = vmul.f32 %v2894_v51, %v1896_v43 }
 0xc12   :  { %v2070_v43 = vsel %vm68_vm0, %v2056_v32, 0.0 }
 0xc13   :  { %v2156_v45 = vmul.f32 %v2154_v2, %v2136_v55  ;;  %v2063_v19 = vsel %vm68_vm0, %v2055_v29, 0.0 }
 0xc15   :  { %v2157_v59 = vpack.c.bf16 %v2156_v45, %v2155_v1 }
 0xc17   :  { %2767 = vmatmul.mubr.bf16.vlgmr.msra.gmra.mrb[56].mxu0 %v2157_v59 }
 0xc21   :  { %v1831_v15 = vpop.xlane.xlu0 %1830 }
 0xc23   :  { %v1834_v17 = vpop.xlane.xlu1 %1833 }
 0xc25   :  { %v1837_v23 = vpop.xlane.xlu0 %1836 }
 0xc26   :  { %2895 = vrcp.f32 %v1837_v23 }
 0xc27   :  { %v1840_v25 = vpop.xlane.xlu1 %1839  ;;  %2897 = vrcp.f32 %v1831_v15 }
 0xc28   :  { %2899 = vrcp.f32 %v1840_v25 }
 0xc29   :  { %2901 = vrcp.f32 %v1834_v17  ;;  %v1843_v27 = vpop.xlane.xlu0 %1842 }
 0xc2a   :  { %2903 = vrcp.f32 %v1843_v27  ;;  %v2297_v27 = vld [vmem:[%s3755_s6] sm:$0xff] }
 0xc2b   :  { %v1846_v56 = vpop.xlane.xlu1 %1845  ;;  %v2301_v51 = vpack.c.bf16 %v2298_v47, %v2297_v27 }
 0xc2c   :  { %2905 = vrcp.f32 %v1846_v56  ;;  %v2299_v56 = vld [vmem:[%s3755_s6 + $0x10] sm:$0xff] }
 0xc2d   :  { %2771 = vmatpush3.bf16.msra.mxu1 %v2301_v51 }
 0xc2e   :  { %2772 = vmatprep.subr.bf16.mxu1 %v2969_v16 }
 0xc30   :  { %v2896_v57 = vpop.eup %2895 }
 0xc31   :  { %v2898_v28 = vpop.eup %2897  ;;  %v2059_v37 = vmul.f32 %v2896_v57, %v1992_v49  ;;  %v2300_v57 = vld [vmem:[%s3755_s6 + $0x18] sm:$0xff] }
 0xc32   :  { %v2900_v30 = vpop.eup %2899 }
 0xc33   :  { %v2902_v39 = vpop.eup %2901  ;;  %v2060_v4 = vmul.f32 %v2900_v30, %v3709_v36  ;;  %v2066_v34 = vsel %vm68_vm0, %v2059_v37, 0.0 }
 0xc34   :  { %v2904_v50 = vpop.eup %2903 }
 0xc35   :  { %v2073_v49 = vsel %vm68_vm0, %v2060_v4, 0.0 }
 0xc36   :  { %v2906_v44 = vpop.eup %2905 }
 0xc6a   :  { %v1944_v31 = vpop.f32.mrb[48].mxu0 }
 0xc6b   :  { %v2057_v33 = vmul.f32 %v2898_v28, %v1944_v31  ;;  %v2728_v35 = vpop.f32.mrb[49].mxu0  ;;  %v2302_v28 = vpack.c.bf16 %v2300_v57, %v2299_v56 }
 0xc6c   :  { %v1947_v13 = vpop.f32.mrb[50].mxu0 }
 0xc6d   :  { %v2064_v24 = vsel %vm68_vm0, %v2057_v33, 0.0  ;;  %v2058_v61 = vmul.f32 %v2902_v39, %v1947_v13  ;;  %v2729_v5 = vpop.f32.mrb[51].mxu0  ;;  %2773 = vmatpush3.bf16.msra.mxu1 %v2302_v28 }
 0xc6e   :  { %v2065_v42 = vadd.f32 %v2064_v24, %v2063_v19  ;;  %v2469_v24 = vld [vmem:[%s3755_s6 + $0x20] ss:$0 sm:$0xff] }
 0xc6f   :  { %v2071_v48 = vsel %vm68_vm0, %v2058_v61, 0.0 }
 0xc70   :  { %v2072_v6 = vadd.f32 %v2071_v48, %v2070_v43  ;;  %v2067_v7 = vadd.f32 %v2066_v34, %v2065_v42 }
 0xc72   :  { %v2040_v53 = vpop.f32.mrb[52].mxu0  ;;  %v2074_v38 = vadd.f32 %v2073_v49, %v2072_v6 }
 0xc73   :  { %v2061_v22 = vmul.f32 %v2904_v50, %v2040_v53  ;;  %v2740_v14 = vpop.f32.mrb[53].mxu0 }
 0xc74   :  { %v2043_v21 = vpop.f32.mrb[54].mxu0 }
 0xc75   :  { %v2068_v36 = vsel %vm68_vm0, %v2061_v22, 0.0  ;;  %v2062_v55 = vmul.f32 %v2906_v44, %v2043_v21  ;;  %v2741_v18 = vpop.f32.mrb[55].mxu0 }
 0xc76   :  { %v2069_v60 = vadd.f32 %v2068_v36, %v2067_v7 }
 0xc77   :  { %v2075_v54 = vsel %vm68_vm0, %v2062_v55, 0.0 }
 0xc78   :  { %v2076_v62 = vadd.f32 %v2075_v54, %v2074_v38  ;;  %v2267_v63 = vadd.f32 %v2069_v60, %v3411_v12 }
 0xc7a   :  { %v2268_v46 = vadd.f32 %v2076_v62, %v3416_v20 }
 0xcea   :  { %v2260_v41 = vpop.f32.mrb[56].mxu0 }
 0xceb   :  { %v2261_v0 = vadd.f32 %v2460_v58, %v2260_v41  ;;  %v2768_v3 = vpop.f32.mrb[57].mxu0 }
 0xcec   :  { %v2263_v26 = vpop.f32.mrb[58].mxu0 }
 0xced   :  { %v2264_v40 = vadd.f32 %v2460_v58, %v2263_v26  ;;  %v2769_v9 = vpop.f32.mrb[59].mxu0  ;;  %v2269_v11 = vadd.f32 %v2267_v63, %v2261_v0 }
 0xcef   :  { %v2271_v52 = vsel %vm68_vm0, %v2269_v11, 0.0  ;;  %v2270_v2 = vadd.f32 %v2268_v46, %v2264_v40 }
 0xcf0   :  { %2272 = vadd.xlane.f32.xlu0 %v2271_v52 }
 0xcf1   :  { %v2274_v1 = vsel %vm68_vm0, %v2270_v2, 0.0 }
 0xcf2   :  { %2275 = vadd.xlane.f32.xlu1 %v2274_v1 }
 0xd7d   :  { %v2273_v45 = vpop.xlane.xlu0 %2272 }
 0xd7e   :  { %v2277_v59 = vmul.f32 0.03125, %v2273_v45 }
 0xd7f   :  { %v2276_v8 = vpop.xlane.xlu1 %2275 }
 0xd80   :  { %v2279_v10 = vsub.f32 %v2269_v11, %v2277_v59  ;;  %v2278_v15 = vmul.f32 0.03125, %v2276_v8 }
 0xd82   :  { %v2280_v17 = vsub.f32 %v2270_v2, %v2278_v15  ;;  %v2281_v12 = vmul.f32 %v2279_v10, %v2279_v10 }
 0xd84   :  { %v2283_v23 = vsel %vm68_vm0, %v2281_v12, 0.0  ;;  %v2282_v25 = vmul.f32 %v2280_v17, %v2280_v17 }
 0xd85   :  { %2284 = vadd.xlane.f32.xlu0 %v2283_v23 }
 0xd86   :  { %v2286_v20 = vsel %vm68_vm0, %v2282_v25, 0.0 }
 0xd87   :  { %2287 = vadd.xlane.f32.xlu1 %v2286_v20 }
 0xe12   :  { %v2285_v29 = vpop.xlane.xlu0 %2284 }
 0xe13   :  { %v2289_v30 = vmul.f32 0.03125, %v2285_v29 }
 0xe14   :  { %v2288_v31 = vpop.xlane.xlu1 %2287 }
 0xe15   :  { %v2291_v32 = vadd.f32 1e-05, %v2289_v30  ;;  %v2290_v33 = vmul.f32 0.03125, %v2288_v31 }
 0xe17   :  { %2907 = vrsqrt.f32 %v2291_v32  ;;  %v2292_v35 = vadd.f32 1e-05, %v2290_v33 }
 0xe19   :  { %2909 = vrsqrt.f32 %v2292_v35 }
 0xe21   :  { %v2908_v37 = vpop.eup %2907 }
 0xe22   :  { %v2295_v39 = vmul.f32 %v2908_v37, %v2279_v10 }
 0xe23   :  { %v2910_v16 = vpop.eup %2909 }
 0xe24   :  { %v2296_v13 = vmul.f32 %v2910_v16, %v2280_v17 }
 0xe26   :  { %v2304_v19 = vpack.c.bf16 %v2296_v13, %v2295_v39 }
 0xe28   :  { %2775 = vmatmul.mubr.msk.bf16.vlgmr.msra.gmra.mrb[52].mxu1 %vm68_vm0, %v2304_v19 }
 0xefb   :  { %v2346_v61 = vpop.f32.mrb[52].mxu1 }
 0xefc   :  { %v2347_v5 = vadd.f32 %v2469_v24, %v2346_v61  ;;  %v2776_v4 = vpop.f32.mrb[53].mxu1 }
 0xefd   :  { %v2349_v42 = vpop.f32.mrb[54].mxu1 }
 0xefe   :  { %2353 = vst [vmem:[%s3756_s7] sm:$0xff] %v2347_v5  ;;  %v2350_v43 = vadd.f32 %v2469_v24, %v2349_v42  ;;  %v2777_v48 = vpop.f32.mrb[55].mxu1 }
 0xf00   :  { %2354 = vst [vmem:[%s3756_s7 + $0x8] sm:$0xff] %v2350_v43 }
 0xf01   :  { %2359 = vsyncpa [#allocation3], 1 }
 0xf02   :  { %2360 = vsyncpa [#allocation5], 1 }

</bundles_post_ra>
